<compile_context>
chip_gen: v7x
topology: tpu7x:2x2x1
jax: 0.10.0
libtpu: 0.0.40
codegen_flags: <defaults>
</compile_context>

<pallas_src>
import jax
import jax.numpy as jnp
from jax import lax
from jax.experimental import pallas as pl
from jax.experimental.pallas import tpu as pltpu

EPS = 1e-5          # BatchNorm1d default eps
NEG_SLOPE = 0.2     # LeakyReLU negative slope
K = 7               # conv kernel size
PAD = (K - 1) // 2  # 'same' padding


# ---------------------------------------------------------------------------
# Fused encoder kernel: every intermediate activation stays in VMEM.
# ---------------------------------------------------------------------------
def _encoder_kernel(x_ref,
                    w1_ref, g1_ref, bt1_ref,
                    w2_ref, g2_ref, bt2_ref,
                    w3_ref, g3_ref, bt3_ref,
                    o_ref,
                    xpad1_s, xcol1_s, xpad2_s, xcol2_s, xpad3_s, xcol3_s):

    def conv_bn_lrelu(x, w_ref, gamma_ref, beta_ref, xpad_s, xcol_s):
        # x         : (B, L, Cin)  f32 activated input of this layer
        # w_ref     : (K*Cin, Cout) bf16 im2col-folded conv weight
        # gamma/beta: (1, Cout)    f32 BatchNorm affine parameters
        # xpad_s    : (B, L+2*PAD, Cin) bf16 halo-padded activations (scratch)
        # xcol_s    : (B, L, K*Cin)     bf16 im2col buffer (scratch)
        b, l, cin = x.shape
        kcin, cout = w_ref.shape
        n = b * l

        # Halo-only zeroing + single bf16 downcast of the activated input.
        zeros = jnp.zeros((b, PAD, cin), xpad_s.dtype)
        xpad_s[:, 0:PAD, :] = zeros
        xpad_s[:, PAD + l:PAD + l + PAD, :] = zeros
        xpad_s[:, PAD:PAD + l, :] = x.astype(xpad_s.dtype)

        # im2col: fold the 7 taps into the contraction dimension.
        for k in range(K):
            xcol_s[:, :, k * cin:(k + 1) * cin] = xpad_s[:, k:k + l, :]

        # One MXU matmul per layer: bf16 operands, f32 accumulation.
        # Conv bias omitted: exactly cancelled by training-mode BatchNorm.
        xcol = xcol_s[...].reshape(n, kcin)
        y = jnp.dot(xcol, w_ref[...], preferred_element_type=jnp.float32)

        # Training-mode BatchNorm (batch statistics, biased variance),
        # two-pass / centered for numerical robustness, all in f32.
        inv_n = 1.0 / float(n)
        mean = jnp.sum(y, axis=0, keepdims=True) * inv_n
        yc = y - mean
        var = jnp.sum(yc * yc, axis=0, keepdims=True) * inv_n
        scale = lax.rsqrt(var + EPS) * gamma_ref[...]
        v = yc * scale + beta_ref[...]

        # LeakyReLU(0.2)
        act = jnp.where(v >= 0.0, v, NEG_SLOPE * v)
        return act.reshape(b, l, cout)

    x0 = x_ref[...].astype(jnp.float32)
    a1 = conv_bn_lrelu(x0, w1_ref, g1_ref, bt1_ref, xpad1_s, xcol1_s)
    a2 = conv_bn_lrelu(a1, w2_ref, g2_ref, bt2_ref, xpad2_s, xcol2_s)
    a3 = conv_bn_lrelu(a2, w3_ref, g3_ref, bt3_ref, xpad3_s, xcol3_s)
    o_ref[...] = a3.astype(o_ref.dtype)


# ---------------------------------------------------------------------------
# Parameter preparation (done ONCE, outside the hot path).
# ---------------------------------------------------------------------------
def prepare_params(params):
    """(K,Cin,Cout) f32 weight -> (K*Cin,Cout) bf16 im2col layout;
    gamma/beta -> (1,Cout) f32.  The conv bias is dropped: training-mode
    BatchNorm on batch statistics cancels it exactly."""
    prepped = []
    for (w, _b, gamma, beta) in params:
        kk, cin, cout = w.shape
        prepped.append((
            w.reshape(kk * cin, cout).astype(jnp.bfloat16),
            gamma.reshape(1, cout).astype(jnp.float32),
            beta.reshape(1, cout).astype(jnp.float32),
        ))
    return prepped


# ---------------------------------------------------------------------------
# Encoder forward (single fused pallas_call).
# ---------------------------------------------------------------------------
@jax.jit
def encoder_forward(x_ncl, prepped):
    """x_ncl: (B, in_dim, L) float32 (PyTorch NCL). Returns (B, 256, L) f32."""
    (w1, g1, bt1), (w2, g2, bt2), (w3, g3, bt3) = prepped
    x = jnp.transpose(x_ncl, (0, 2, 1))              # (B, L, Cin) channels-last
    B, L, c0 = x.shape
    c1, c2, c3 = w1.shape[1], w2.shape[1], w3.shape[1]

    out = pl.pallas_call(
        _encoder_kernel,
        out_shape=jax.ShapeDtypeStruct((B, L, c3), jnp.float32),
        grid=(1,),
        in_specs=[
            pl.BlockSpec((B, L, c0), lambda i: (0, 0, 0)),
            pl.BlockSpec(w1.shape, lambda i: (0, 0)),
            pl.BlockSpec((1, c1), lambda i: (0, 0)),
            pl.BlockSpec((1, c1), lambda i: (0, 0)),
            pl.BlockSpec(w2.shape, lambda i: (0, 0)),
            pl.BlockSpec((1, c2), lambda i: (0, 0)),
            pl.BlockSpec((1, c2), lambda i: (0, 0)),
            pl.BlockSpec(w3.shape, lambda i: (0, 0)),
            pl.BlockSpec((1, c3), lambda i: (0, 0)),
            pl.BlockSpec((1, c3), lambda i: (0, 0)),
        ],
        out_specs=pl.BlockSpec((B, L, c3), lambda i: (0, 0, 0)),
        scratch_shapes=[
            pltpu.VMEM((B, L + 2 * PAD, c0), jnp.bfloat16),   # layer-1 halo pad
            pltpu.VMEM((B, L, K * c0), jnp.bfloat16),         # layer-1 im2col
            pltpu.VMEM((B, L + 2 * PAD, c1), jnp.bfloat16),   # layer-2 halo pad
            pltpu.VMEM((B, L, K * c1), jnp.bfloat16),         # layer-2 im2col
            pltpu.VMEM((B, L + 2 * PAD, c2), jnp.bfloat16),   # layer-3 halo pad
            pltpu.VMEM((B, L, K * c2), jnp.bfloat16),         # layer-3 im2col
        ],
        compiler_params=pltpu.CompilerParams(
            dimension_semantics=("arbitrary",),
            vmem_limit_bytes=32 * 1024 * 1024),
    )(x, w1, g1, bt1, w2, g2, bt2, w3, g3, bt3)

    # TODO(synk): for L >= 128 write (B, C, L) directly from the kernel.
    return jnp.transpose(out, (0, 2, 1))              # (B, 256, L)


# ---------------------------------------------------------------------------
# Pure-JAX reference (training-mode BN, bias KEPT) used for a tolerance check.
# It rounds operands through bf16 at the same points the kernel does, so the
# comparison also verifies that dropping the conv bias in the kernel is exact.
# ---------------------------------------------------------------------------
def encoder_reference(x_ncl, params):
    act = jnp.transpose(x_ncl, (0, 2, 1)).astype(jnp.float32)   # (B, L, C)
    for (w, b, gamma, beta) in params:
        kk, cin, cout = w.shape
        a = act.astype(jnp.bfloat16).astype(jnp.float32)
        w_col = w.reshape(kk * cin, cout).astype(jnp.bfloat16).astype(jnp.float32)
        L = a.shape[1]
        xpad = jnp.pad(a, ((0, 0), (PAD, PAD), (0, 0)))
        xcol = jnp.concatenate([xpad[:, k:k + L, :] for k in range(kk)], axis=2)
        y = jnp.einsum("blc,cd->bld", xcol, w_col) + b.reshape(1, 1, cout)
        mean = jnp.mean(y, axis=(0, 1), keepdims=True)
        var = jnp.mean(jnp.square(y - mean), axis=(0, 1), keepdims=True)
        v = (y - mean) * lax.rsqrt(var + EPS) * gamma.reshape(1, 1, cout) \
            + beta.reshape(1, 1, cout)
        act = jnp.where(v >= 0.0, v, NEG_SLOPE * v)
    return jnp.transpose(act, (0, 2, 1))


def init_params(in_dim, key):
    """Deterministic synthetic parameters matching the module's shapes.
    Conv weight layout is (K, Cin, Cout); gamma/beta randomized so the BN
    affine path is actually exercised."""
    dims = [(in_dim, 64), (64, 128), (128, 256)]
    params = []
    for (cin, cout) in dims:
        key, kw, kb, kg, kbeta = jax.random.split(key, 5)
        fan_in = cin * K
        w = jax.random.normal(kw, (K, cin, cout), jnp.float32) / jnp.sqrt(fan_in)
        b = 0.05 * jax.random.normal(kb, (cout,), jnp.float32)
        gamma = 1.0 + 0.1 * jax.random.normal(kg, (cout,), jnp.float32)
        beta = 0.1 * jax.random.normal(kbeta, (cout,), jnp.float32)
        params.append((w, b, gamma, beta))
    return params


if __name__ == "__main__":
    B, IN_DIM, L = 2, 4, 16
    key = jax.random.PRNGKey(0)
    key, kx = jax.random.split(key)
    x = jax.random.normal(kx, (B, IN_DIM, L), jnp.float32)   # PyTorch NCL layout

    params = init_params(IN_DIM, key)
    prepped = prepare_params(params)

    out = encoder_forward(x, prepped)
    out = jax.block_until_ready(out)

    assert out.shape == (B, 256, L), out.shape
    assert out.dtype == jnp.float32
    assert bool(jnp.all(jnp.isfinite(out)))

    ref = encoder_reference(x, params)
    max_err = float(jnp.max(jnp.abs(out - ref)))
    assert max_err < 5e-2, f"max |err| vs reference = {max_err}"

    print("KERNEL_OK")
</pallas_src>

<mosaic_0001>
module attributes {stable_mosaic.version = 11 : i64} {
  func.func @_encoder_kernel(%arg0: i32, %arg1: memref<2x16x4xf32, #tpu.memory_space<vmem>>, %arg2: memref<28x64xbf16, #tpu.memory_space<vmem>>, %arg3: memref<1x64xf32, #tpu.memory_space<vmem>>, %arg4: memref<1x64xf32, #tpu.memory_space<vmem>>, %arg5: memref<448x128xbf16, #tpu.memory_space<vmem>>, %arg6: memref<1x128xf32, #tpu.memory_space<vmem>>, %arg7: memref<1x128xf32, #tpu.memory_space<vmem>>, %arg8: memref<896x256xbf16, #tpu.memory_space<vmem>>, %arg9: memref<1x256xf32, #tpu.memory_space<vmem>>, %arg10: memref<1x256xf32, #tpu.memory_space<vmem>>, %arg11: memref<2x16x256xf32, #tpu.memory_space<vmem>>, %arg12: memref<2x22x4xbf16, #tpu.memory_space<vmem>>, %arg13: memref<2x16x28xbf16, #tpu.memory_space<vmem>>, %arg14: memref<2x22x64xbf16, #tpu.memory_space<vmem>>, %arg15: memref<2x16x448xbf16, #tpu.memory_space<vmem>>, %arg16: memref<2x22x128xbf16, #tpu.memory_space<vmem>>, %arg17: memref<2x16x896xbf16, #tpu.memory_space<vmem>>) attributes {dimension_semantics = [#tpu.dimension_semantics<arbitrary>], iteration_bounds = array<i64: 1>, scalar_prefetch = 0 : i64, scratch_operands = 6 : i64, tpu.core_type = #tpu.core_type<tc>, window_params = [{pipeline_mode = #tpu.pipeline_mode<synchronous>, transform_indices = @transform_0, window_bounds = array<i64: 2, 16, 4>}, {pipeline_mode = #tpu.pipeline_mode<synchronous>, transform_indices = @transform_1, window_bounds = array<i64: 28, 64>}, {pipeline_mode = #tpu.pipeline_mode<synchronous>, transform_indices = @transform_2, window_bounds = array<i64: 1, 64>}, {pipeline_mode = #tpu.pipeline_mode<synchronous>, transform_indices = @transform_3, window_bounds = array<i64: 1, 64>}, {pipeline_mode = #tpu.pipeline_mode<synchronous>, transform_indices = @transform_4, window_bounds = array<i64: 448, 128>}, {pipeline_mode = #tpu.pipeline_mode<synchronous>, transform_indices = @transform_5, window_bounds = array<i64: 1, 128>}, {pipeline_mode = #tpu.pipeline_mode<synchronous>, transform_indices = @transform_6, window_bounds = array<i64: 1, 128>}, {pipeline_mode = #tpu.pipeline_mode<synchronous>, transform_indices = @transform_7, window_bounds = array<i64: 896, 256>}, {pipeline_mode = #tpu.pipeline_mode<synchronous>, transform_indices = @transform_8, window_bounds = array<i64: 1, 256>}, {pipeline_mode = #tpu.pipeline_mode<synchronous>, transform_indices = @transform_9, window_bounds = array<i64: 1, 256>}, {pipeline_mode = #tpu.pipeline_mode<synchronous>, transform_indices = @transform_10, window_bounds = array<i64: 2, 16, 256>}]} {
    %c0 = arith.constant 0 : index
    %c0_0 = arith.constant 0 : index
    %c0_1 = arith.constant 0 : index
    %0 = vector.load %arg1[%c0, %c0_0, %c0_1] : memref<2x16x4xf32, #tpu.memory_space<vmem>>, vector<2x16x4xf32>
    %cst = arith.constant 0.000000e+00 : bf16
    %1 = vector.broadcast %cst : bf16 to vector<2x3x4xbf16>
    %c0_2 = arith.constant 0 : index
    %c0_3 = arith.constant 0 : index
    %c0_4 = arith.constant 0 : index
    %2 = vector.load %arg12[%c0_2, %c0_3, %c0_4] : memref<2x22x4xbf16, #tpu.memory_space<vmem>>, vector<2x3x4xbf16>
    tpu.vector_store %arg12[%c0_2, %c0_3, %c0_4], %1 {strides = array<i32>} : memref<2x22x4xbf16, #tpu.memory_space<vmem>>, vector<2x3x4xbf16>,
    %c0_5 = arith.constant 0 : index
    %c19 = arith.constant 19 : index
    %c0_6 = arith.constant 0 : index
    %3 = vector.load %arg12[%c0_5, %c19, %c0_6] : memref<2x22x4xbf16, #tpu.memory_space<vmem>>, vector<2x3x4xbf16>
    tpu.vector_store %arg12[%c0_5, %c19, %c0_6], %1 {strides = array<i32>} : memref<2x22x4xbf16, #tpu.memory_space<vmem>>, vector<2x3x4xbf16>,
    %4 = arith.truncf %0 : vector<2x16x4xf32> to vector<2x16x4xbf16>
    %c0_7 = arith.constant 0 : index
    %c3 = arith.constant 3 : index
    %c0_8 = arith.constant 0 : index
    %5 = vector.load %arg12[%c0_7, %c3, %c0_8] : memref<2x22x4xbf16, #tpu.memory_space<vmem>>, vector<2x16x4xbf16>
    tpu.vector_store %arg12[%c0_7, %c3, %c0_8], %4 {strides = array<i32>} : memref<2x22x4xbf16, #tpu.memory_space<vmem>>, vector<2x16x4xbf16>,
    %c0_9 = arith.constant 0 : index
    %c0_10 = arith.constant 0 : index
    %c0_11 = arith.constant 0 : index
    %6 = vector.load %arg12[%c0_9, %c0_10, %c0_11] : memref<2x22x4xbf16, #tpu.memory_space<vmem>>, vector<2x16x4xbf16>
    %c0_12 = arith.constant 0 : index
    %c0_13 = arith.constant 0 : index
    %c0_14 = arith.constant 0 : index
    %7 = vector.load %arg13[%c0_12, %c0_13, %c0_14] : memref<2x16x28xbf16, #tpu.memory_space<vmem>>, vector<2x16x4xbf16>
    tpu.vector_store %arg13[%c0_12, %c0_13, %c0_14], %6 {strides = array<i32>} : memref<2x16x28xbf16, #tpu.memory_space<vmem>>, vector<2x16x4xbf16>,
    %c0_15 = arith.constant 0 : index
    %c1 = arith.constant 1 : index
    %c0_16 = arith.constant 0 : index
    %8 = vector.load %arg12[%c0_15, %c1, %c0_16] : memref<2x22x4xbf16, #tpu.memory_space<vmem>>, vector<2x16x4xbf16>
    %c0_17 = arith.constant 0 : index
    %c0_18 = arith.constant 0 : index
    %c4 = arith.constant 4 : index
    %9 = vector.load %arg13[%c0_17, %c0_18, %c4] : memref<2x16x28xbf16, #tpu.memory_space<vmem>>, vector<2x16x4xbf16>
    tpu.vector_store %arg13[%c0_17, %c0_18, %c4], %8 {strides = array<i32>} : memref<2x16x28xbf16, #tpu.memory_space<vmem>>, vector<2x16x4xbf16>,
    %c0_19 = arith.constant 0 : index
    %c2 = arith.constant 2 : index
    %c0_20 = arith.constant 0 : index
    %10 = vector.load %arg12[%c0_19, %c2, %c0_20] : memref<2x22x4xbf16, #tpu.memory_space<vmem>>, vector<2x16x4xbf16>
    %c0_21 = arith.constant 0 : index
    %c0_22 = arith.constant 0 : index
    %c8 = arith.constant 8 : index
    %11 = vector.load %arg13[%c0_21, %c0_22, %c8] : memref<2x16x28xbf16, #tpu.memory_space<vmem>>, vector<2x16x4xbf16>
    tpu.vector_store %arg13[%c0_21, %c0_22, %c8], %10 {strides = array<i32>} : memref<2x16x28xbf16, #tpu.memory_space<vmem>>, vector<2x16x4xbf16>,
    %c0_23 = arith.constant 0 : index
    %c3_24 = arith.constant 3 : index
    %c0_25 = arith.constant 0 : index
    %12 = vector.load %arg12[%c0_23, %c3_24, %c0_25] : memref<2x22x4xbf16, #tpu.memory_space<vmem>>, vector<2x16x4xbf16>
    %c0_26 = arith.constant 0 : index
    %c0_27 = arith.constant 0 : index
    %c12 = arith.constant 12 : index
    %13 = vector.load %arg13[%c0_26, %c0_27, %c12] : memref<2x16x28xbf16, #tpu.memory_space<vmem>>, vector<2x16x4xbf16>
    tpu.vector_store %arg13[%c0_26, %c0_27, %c12], %12 {strides = array<i32>} : memref<2x16x28xbf16, #tpu.memory_space<vmem>>, vector<2x16x4xbf16>,
    %c0_28 = arith.constant 0 : index
    %c4_29 = arith.constant 4 : index
    %c0_30 = arith.constant 0 : index
    %14 = vector.load %arg12[%c0_28, %c4_29, %c0_30] : memref<2x22x4xbf16, #tpu.memory_space<vmem>>, vector<2x16x4xbf16>
    %c0_31 = arith.constant 0 : index
    %c0_32 = arith.constant 0 : index
    %c16 = arith.constant 16 : index
    %15 = vector.load %arg13[%c0_31, %c0_32, %c16] : memref<2x16x28xbf16, #tpu.memory_space<vmem>>, vector<2x16x4xbf16>
    tpu.vector_store %arg13[%c0_31, %c0_32, %c16], %14 {strides = array<i32>} : memref<2x16x28xbf16, #tpu.memory_space<vmem>>, vector<2x16x4xbf16>,
    %c0_33 = arith.constant 0 : index
    %c5 = arith.constant 5 : index
    %c0_34 = arith.constant 0 : index
    %16 = vector.load %arg12[%c0_33, %c5, %c0_34] : memref<2x22x4xbf16, #tpu.memory_space<vmem>>, vector<2x16x4xbf16>
    %c0_35 = arith.constant 0 : index
    %c0_36 = arith.constant 0 : index
    %c20 = arith.constant 20 : index
    %17 = vector.load %arg13[%c0_35, %c0_36, %c20] : memref<2x16x28xbf16, #tpu.memory_space<vmem>>, vector<2x16x4xbf16>
    tpu.vector_store %arg13[%c0_35, %c0_36, %c20], %16 {strides = array<i32>} : memref<2x16x28xbf16, #tpu.memory_space<vmem>>, vector<2x16x4xbf16>,
    %c0_37 = arith.constant 0 : index
    %c6 = arith.constant 6 : index
    %c0_38 = arith.constant 0 : index
    %18 = vector.load %arg12[%c0_37, %c6, %c0_38] : memref<2x22x4xbf16, #tpu.memory_space<vmem>>, vector<2x16x4xbf16>
    %c0_39 = arith.constant 0 : index
    %c0_40 = arith.constant 0 : index
    %c24 = arith.constant 24 : index
    %19 = vector.load %arg13[%c0_39, %c0_40, %c24] : memref<2x16x28xbf16, #tpu.memory_space<vmem>>, vector<2x16x4xbf16>
    tpu.vector_store %arg13[%c0_39, %c0_40, %c24], %18 {strides = array<i32>} : memref<2x16x28xbf16, #tpu.memory_space<vmem>>, vector<2x16x4xbf16>,
    %c0_41 = arith.constant 0 : index
    %c0_42 = arith.constant 0 : index
    %c0_43 = arith.constant 0 : index
    %20 = vector.load %arg13[%c0_41, %c0_42, %c0_43] : memref<2x16x28xbf16, #tpu.memory_space<vmem>>, vector<2x16x28xbf16>
    %21 = vector.shape_cast %20 : vector<2x16x28xbf16> to vector<32x28xbf16>
    %c0_44 = arith.constant 0 : index
    %c0_45 = arith.constant 0 : index
    %22 = vector.load %arg2[%c0_44, %c0_45] : memref<28x64xbf16, #tpu.memory_space<vmem>>, vector<28x64xbf16>
    %cst_46 = arith.constant dense<0.000000e+00> : vector<32x64xf32>
    %23 = tpu.matmul %21, %22, %cst_46 {dimension_numbers = #tpu.dot_dimension_numbers<[1], [0], [0], [1], [0, 0, 1, 1], [], []>} : vector<32x28xbf16>, vector<28x64xbf16>, vector<32x64xf32> -> vector<32x64xf32>
    %cst_47 = arith.constant dense<0.000000e+00> : vector<64xf32>
    %24 = vector.multi_reduction <add>, %23, %cst_47 [0] : vector<32x64xf32> to vector<64xf32>
    %25 = vector.shape_cast %24 : vector<64xf32> to vector<1x64xf32>
    %cst_48 = arith.constant 3.125000e-02 : f32
    %26 = vector.broadcast %cst_48 : f32 to vector<1x64xf32>
    %27 = arith.mulf %25, %26 : vector<1x64xf32>
    %28 = vector.broadcast %27 : vector<1x64xf32> to vector<32x64xf32>
    %29 = arith.subf %23, %28 : vector<32x64xf32>
    %30 = arith.mulf %29, %29 : vector<32x64xf32>
    %cst_49 = arith.constant dense<0.000000e+00> : vector<64xf32>
    %31 = vector.multi_reduction <add>, %30, %cst_49 [0] : vector<32x64xf32> to vector<64xf32>
    %32 = vector.shape_cast %31 : vector<64xf32> to vector<1x64xf32>
    %cst_50 = arith.constant 3.125000e-02 : f32
    %33 = vector.broadcast %cst_50 : f32 to vector<1x64xf32>
    %34 = arith.mulf %32, %33 : vector<1x64xf32>
    %cst_51 = arith.constant 9.99999974E-6 : f32
    %35 = vector.broadcast %cst_51 : f32 to vector<1x64xf32>
    %36 = arith.addf %34, %35 : vector<1x64xf32>
    %37 = math.rsqrt %36 : vector<1x64xf32>
    %c0_52 = arith.constant 0 : index
    %c0_53 = arith.constant 0 : index
    %38 = vector.load %arg3[%c0_52, %c0_53] : memref<1x64xf32, #tpu.memory_space<vmem>>, vector<1x64xf32>
    %39 = arith.mulf %37, %38 : vector<1x64xf32>
    %40 = vector.broadcast %39 : vector<1x64xf32> to vector<32x64xf32>
    %41 = arith.mulf %29, %40 : vector<32x64xf32>
    %c0_54 = arith.constant 0 : index
    %c0_55 = arith.constant 0 : index
    %42 = vector.load %arg4[%c0_54, %c0_55] : memref<1x64xf32, #tpu.memory_space<vmem>>, vector<1x64xf32>
    %43 = vector.broadcast %42 : vector<1x64xf32> to vector<32x64xf32>
    %44 = arith.addf %41, %43 : vector<32x64xf32>
    %cst_56 = arith.constant 0.000000e+00 : f32
    %45 = vector.broadcast %cst_56 : f32 to vector<32x64xf32>
    %46 = arith.cmpf oge, %44, %45 : vector<32x64xf32>
    %cst_57 = arith.constant 2.000000e-01 : f32
    %47 = vector.broadcast %cst_57 : f32 to vector<32x64xf32>
    %48 = arith.mulf %47, %44 : vector<32x64xf32>
    %49 = arith.select %46, %44, %48 : vector<32x64xi1>, vector<32x64xf32>
    %50 = vector.shape_cast %49 : vector<32x64xf32> to vector<2x16x64xf32>
    %cst_58 = arith.constant 0.000000e+00 : bf16
    %51 = vector.broadcast %cst_58 : bf16 to vector<2x3x64xbf16>
    %c0_59 = arith.constant 0 : index
    %c0_60 = arith.constant 0 : index
    %c0_61 = arith.constant 0 : index
    %52 = vector.load %arg14[%c0_59, %c0_60, %c0_61] : memref<2x22x64xbf16, #tpu.memory_space<vmem>>, vector<2x3x64xbf16>
    tpu.vector_store %arg14[%c0_59, %c0_60, %c0_61], %51 {strides = array<i32>} : memref<2x22x64xbf16, #tpu.memory_space<vmem>>, vector<2x3x64xbf16>,
    %c0_62 = arith.constant 0 : index
    %c19_63 = arith.constant 19 : index
    %c0_64 = arith.constant 0 : index
    %53 = vector.load %arg14[%c0_62, %c19_63, %c0_64] : memref<2x22x64xbf16, #tpu.memory_space<vmem>>, vector<2x3x64xbf16>
    tpu.vector_store %arg14[%c0_62, %c19_63, %c0_64], %51 {strides = array<i32>} : memref<2x22x64xbf16, #tpu.memory_space<vmem>>, vector<2x3x64xbf16>,
    %54 = arith.truncf %50 : vector<2x16x64xf32> to vector<2x16x64xbf16>
    %c0_65 = arith.constant 0 : index
    %c3_66 = arith.constant 3 : index
    %c0_67 = arith.constant 0 : index
    %55 = vector.load %arg14[%c0_65, %c3_66, %c0_67] : memref<2x22x64xbf16, #tpu.memory_space<vmem>>, vector<2x16x64xbf16>
    tpu.vector_store %arg14[%c0_65, %c3_66, %c0_67], %54 {strides = array<i32>} : memref<2x22x64xbf16, #tpu.memory_space<vmem>>, vector<2x16x64xbf16>,
    %c0_68 = arith.constant 0 : index
    %c0_69 = arith.constant 0 : index
    %c0_70 = arith.constant 0 : index
    %56 = vector.load %arg14[%c0_68, %c0_69, %c0_70] : memref<2x22x64xbf16, #tpu.memory_space<vmem>>, vector<2x16x64xbf16>
    %c0_71 = arith.constant 0 : index
    %c0_72 = arith.constant 0 : index
    %c0_73 = arith.constant 0 : index
    %57 = vector.load %arg15[%c0_71, %c0_72, %c0_73] : memref<2x16x448xbf16, #tpu.memory_space<vmem>>, vector<2x16x64xbf16>
    tpu.vector_store %arg15[%c0_71, %c0_72, %c0_73], %56 {strides = array<i32>} : memref<2x16x448xbf16, #tpu.memory_space<vmem>>, vector<2x16x64xbf16>,
    %c0_74 = arith.constant 0 : index
    %c1_75 = arith.constant 1 : index
    %c0_76 = arith.constant 0 : index
    %58 = vector.load %arg14[%c0_74, %c1_75, %c0_76] : memref<2x22x64xbf16, #tpu.memory_space<vmem>>, vector<2x16x64xbf16>
    %c0_77 = arith.constant 0 : index
    %c0_78 = arith.constant 0 : index
    %c64 = arith.constant 64 : index
    %59 = vector.load %arg15[%c0_77, %c0_78, %c64] : memref<2x16x448xbf16, #tpu.memory_space<vmem>>, vector<2x16x64xbf16>
    tpu.vector_store %arg15[%c0_77, %c0_78, %c64], %58 {strides = array<i32>} : memref<2x16x448xbf16, #tpu.memory_space<vmem>>, vector<2x16x64xbf16>,
    %c0_79 = arith.constant 0 : index
    %c2_80 = arith.constant 2 : index
    %c0_81 = arith.constant 0 : index
    %60 = vector.load %arg14[%c0_79, %c2_80, %c0_81] : memref<2x22x64xbf16, #tpu.memory_space<vmem>>, vector<2x16x64xbf16>
    %c0_82 = arith.constant 0 : index
    %c0_83 = arith.constant 0 : index
    %c128 = arith.constant 128 : index
    %61 = vector.load %arg15[%c0_82, %c0_83, %c128] : memref<2x16x448xbf16, #tpu.memory_space<vmem>>, vector<2x16x64xbf16>
    tpu.vector_store %arg15[%c0_82, %c0_83, %c128], %60 {strides = array<i32>} : memref<2x16x448xbf16, #tpu.memory_space<vmem>>, vector<2x16x64xbf16>,
    %c0_84 = arith.constant 0 : index
    %c3_85 = arith.constant 3 : index
    %c0_86 = arith.constant 0 : index
    %62 = vector.load %arg14[%c0_84, %c3_85, %c0_86] : memref<2x22x64xbf16, #tpu.memory_space<vmem>>, vector<2x16x64xbf16>
    %c0_87 = arith.constant 0 : index
    %c0_88 = arith.constant 0 : index
    %c192 = arith.constant 192 : index
    %63 = vector.load %arg15[%c0_87, %c0_88, %c192] : memref<2x16x448xbf16, #tpu.memory_space<vmem>>, vector<2x16x64xbf16>
    tpu.vector_store %arg15[%c0_87, %c0_88, %c192], %62 {strides = array<i32>} : memref<2x16x448xbf16, #tpu.memory_space<vmem>>, vector<2x16x64xbf16>,
    %c0_89 = arith.constant 0 : index
    %c4_90 = arith.constant 4 : index
    %c0_91 = arith.constant 0 : index
    %64 = vector.load %arg14[%c0_89, %c4_90, %c0_91] : memref<2x22x64xbf16, #tpu.memory_space<vmem>>, vector<2x16x64xbf16>
    %c0_92 = arith.constant 0 : index
    %c0_93 = arith.constant 0 : index
    %c256 = arith.constant 256 : index
    %65 = vector.load %arg15[%c0_92, %c0_93, %c256] : memref<2x16x448xbf16, #tpu.memory_space<vmem>>, vector<2x16x64xbf16>
    tpu.vector_store %arg15[%c0_92, %c0_93, %c256], %64 {strides = array<i32>} : memref<2x16x448xbf16, #tpu.memory_space<vmem>>, vector<2x16x64xbf16>,
    %c0_94 = arith.constant 0 : index
    %c5_95 = arith.constant 5 : index
    %c0_96 = arith.constant 0 : index
    %66 = vector.load %arg14[%c0_94, %c5_95, %c0_96] : memref<2x22x64xbf16, #tpu.memory_space<vmem>>, vector<2x16x64xbf16>
    %c0_97 = arith.constant 0 : index
    %c0_98 = arith.constant 0 : index
    %c320 = arith.constant 320 : index
    %67 = vector.load %arg15[%c0_97, %c0_98, %c320] : memref<2x16x448xbf16, #tpu.memory_space<vmem>>, vector<2x16x64xbf16>
    tpu.vector_store %arg15[%c0_97, %c0_98, %c320], %66 {strides = array<i32>} : memref<2x16x448xbf16, #tpu.memory_space<vmem>>, vector<2x16x64xbf16>,
    %c0_99 = arith.constant 0 : index
    %c6_100 = arith.constant 6 : index
    %c0_101 = arith.constant 0 : index
    %68 = vector.load %arg14[%c0_99, %c6_100, %c0_101] : memref<2x22x64xbf16, #tpu.memory_space<vmem>>, vector<2x16x64xbf16>
    %c0_102 = arith.constant 0 : index
    %c0_103 = arith.constant 0 : index
    %c384 = arith.constant 384 : index
    %69 = vector.load %arg15[%c0_102, %c0_103, %c384] : memref<2x16x448xbf16, #tpu.memory_space<vmem>>, vector<2x16x64xbf16>
    tpu.vector_store %arg15[%c0_102, %c0_103, %c384], %68 {strides = array<i32>} : memref<2x16x448xbf16, #tpu.memory_space<vmem>>, vector<2x16x64xbf16>,
    %c0_104 = arith.constant 0 : index
    %c0_105 = arith.constant 0 : index
    %c0_106 = arith.constant 0 : index
    %70 = vector.load %arg15[%c0_104, %c0_105, %c0_106] : memref<2x16x448xbf16, #tpu.memory_space<vmem>>, vector<2x16x448xbf16>
    %71 = vector.shape_cast %70 : vector<2x16x448xbf16> to vector<32x448xbf16>
    %c0_107 = arith.constant 0 : index
    %c0_108 = arith.constant 0 : index
    %72 = vector.load %arg5[%c0_107, %c0_108] : memref<448x128xbf16, #tpu.memory_space<vmem>>, vector<448x128xbf16>
    %cst_109 = arith.constant dense<0.000000e+00> : vector<32x128xf32>
    %73 = tpu.matmul %71, %72, %cst_109 {dimension_numbers = #tpu.dot_dimension_numbers<[1], [0], [0], [1], [0, 0, 1, 1], [], []>} : vector<32x448xbf16>, vector<448x128xbf16>, vector<32x128xf32> -> vector<32x128xf32>
    %cst_110 = arith.constant dense<0.000000e+00> : vector<128xf32>
    %74 = vector.multi_reduction <add>, %73, %cst_110 [0] : vector<32x128xf32> to vector<128xf32>
    %75 = vector.shape_cast %74 : vector<128xf32> to vector<1x128xf32>
    %cst_111 = arith.constant 3.125000e-02 : f32
    %76 = vector.broadcast %cst_111 : f32 to vector<1x128xf32>
    %77 = arith.mulf %75, %76 : vector<1x128xf32>
    %78 = vector.broadcast %77 : vector<1x128xf32> to vector<32x128xf32>
    %79 = arith.subf %73, %78 : vector<32x128xf32>
    %80 = arith.mulf %79, %79 : vector<32x128xf32>
    %cst_112 = arith.constant dense<0.000000e+00> : vector<128xf32>
    %81 = vector.multi_reduction <add>, %80, %cst_112 [0] : vector<32x128xf32> to vector<128xf32>
    %82 = vector.shape_cast %81 : vector<128xf32> to vector<1x128xf32>
    %cst_113 = arith.constant 3.125000e-02 : f32
    %83 = vector.broadcast %cst_113 : f32 to vector<1x128xf32>
    %84 = arith.mulf %82, %83 : vector<1x128xf32>
    %cst_114 = arith.constant 9.99999974E-6 : f32
    %85 = vector.broadcast %cst_114 : f32 to vector<1x128xf32>
    %86 = arith.addf %84, %85 : vector<1x128xf32>
    %87 = math.rsqrt %86 : vector<1x128xf32>
    %c0_115 = arith.constant 0 : index
    %c0_116 = arith.constant 0 : index
    %88 = vector.load %arg6[%c0_115, %c0_116] : memref<1x128xf32, #tpu.memory_space<vmem>>, vector<1x128xf32>
    %89 = arith.mulf %87, %88 : vector<1x128xf32>
    %90 = vector.broadcast %89 : vector<1x128xf32> to vector<32x128xf32>
    %91 = arith.mulf %79, %90 : vector<32x128xf32>
    %c0_117 = arith.constant 0 : index
    %c0_118 = arith.constant 0 : index
    %92 = vector.load %arg7[%c0_117, %c0_118] : memref<1x128xf32, #tpu.memory_space<vmem>>, vector<1x128xf32>
    %93 = vector.broadcast %92 : vector<1x128xf32> to vector<32x128xf32>
    %94 = arith.addf %91, %93 : vector<32x128xf32>
    %cst_119 = arith.constant 0.000000e+00 : f32
    %95 = vector.broadcast %cst_119 : f32 to vector<32x128xf32>
    %96 = arith.cmpf oge, %94, %95 : vector<32x128xf32>
    %cst_120 = arith.constant 2.000000e-01 : f32
    %97 = vector.broadcast %cst_120 : f32 to vector<32x128xf32>
    %98 = arith.mulf %97, %94 : vector<32x128xf32>
    %99 = arith.select %96, %94, %98 : vector<32x128xi1>, vector<32x128xf32>
    %100 = vector.shape_cast %99 : vector<32x128xf32> to vector<2x16x128xf32>
    %cst_121 = arith.constant 0.000000e+00 : bf16
    %101 = vector.broadcast %cst_121 : bf16 to vector<2x3x128xbf16>
    %c0_122 = arith.constant 0 : index
    %c0_123 = arith.constant 0 : index
    %c0_124 = arith.constant 0 : index
    %102 = vector.load %arg16[%c0_122, %c0_123, %c0_124] : memref<2x22x128xbf16, #tpu.memory_space<vmem>>, vector<2x3x128xbf16>
    tpu.vector_store %arg16[%c0_122, %c0_123, %c0_124], %101 {strides = array<i32>} : memref<2x22x128xbf16, #tpu.memory_space<vmem>>, vector<2x3x128xbf16>,
    %c0_125 = arith.constant 0 : index
    %c19_126 = arith.constant 19 : index
    %c0_127 = arith.constant 0 : index
    %103 = vector.load %arg16[%c0_125, %c19_126, %c0_127] : memref<2x22x128xbf16, #tpu.memory_space<vmem>>, vector<2x3x128xbf16>
    tpu.vector_store %arg16[%c0_125, %c19_126, %c0_127], %101 {strides = array<i32>} : memref<2x22x128xbf16, #tpu.memory_space<vmem>>, vector<2x3x128xbf16>,
    %104 = arith.truncf %100 : vector<2x16x128xf32> to vector<2x16x128xbf16>
    %c0_128 = arith.constant 0 : index
    %c3_129 = arith.constant 3 : index
    %c0_130 = arith.constant 0 : index
    %105 = vector.load %arg16[%c0_128, %c3_129, %c0_130] : memref<2x22x128xbf16, #tpu.memory_space<vmem>>, vector<2x16x128xbf16>
    tpu.vector_store %arg16[%c0_128, %c3_129, %c0_130], %104 {strides = array<i32>} : memref<2x22x128xbf16, #tpu.memory_space<vmem>>, vector<2x16x128xbf16>,
    %c0_131 = arith.constant 0 : index
    %c0_132 = arith.constant 0 : index
    %c0_133 = arith.constant 0 : index
    %106 = vector.load %arg16[%c0_131, %c0_132, %c0_133] : memref<2x22x128xbf16, #tpu.memory_space<vmem>>, vector<2x16x128xbf16>
    %c0_134 = arith.constant 0 : index
    %c0_135 = arith.constant 0 : index
    %c0_136 = arith.constant 0 : index
    %107 = vector.load %arg17[%c0_134, %c0_135, %c0_136] : memref<2x16x896xbf16, #tpu.memory_space<vmem>>, vector<2x16x128xbf16>
    tpu.vector_store %arg17[%c0_134, %c0_135, %c0_136], %106 {strides = array<i32>} : memref<2x16x896xbf16, #tpu.memory_space<vmem>>, vector<2x16x128xbf16>,
    %c0_137 = arith.constant 0 : index
    %c1_138 = arith.constant 1 : index
    %c0_139 = arith.constant 0 : index
    %108 = vector.load %arg16[%c0_137, %c1_138, %c0_139] : memref<2x22x128xbf16, #tpu.memory_space<vmem>>, vector<2x16x128xbf16>
    %c0_140 = arith.constant 0 : index
    %c0_141 = arith.constant 0 : index
    %c128_142 = arith.constant 128 : index
    %109 = vector.load %arg17[%c0_140, %c0_141, %c128_142] : memref<2x16x896xbf16, #tpu.memory_space<vmem>>, vector<2x16x128xbf16>
    tpu.vector_store %arg17[%c0_140, %c0_141, %c128_142], %108 {strides = array<i32>} : memref<2x16x896xbf16, #tpu.memory_space<vmem>>, vector<2x16x128xbf16>,
    %c0_143 = arith.constant 0 : index
    %c2_144 = arith.constant 2 : index
    %c0_145 = arith.constant 0 : index
    %110 = vector.load %arg16[%c0_143, %c2_144, %c0_145] : memref<2x22x128xbf16, #tpu.memory_space<vmem>>, vector<2x16x128xbf16>
    %c0_146 = arith.constant 0 : index
    %c0_147 = arith.constant 0 : index
    %c256_148 = arith.constant 256 : index
    %111 = vector.load %arg17[%c0_146, %c0_147, %c256_148] : memref<2x16x896xbf16, #tpu.memory_space<vmem>>, vector<2x16x128xbf16>
    tpu.vector_store %arg17[%c0_146, %c0_147, %c256_148], %110 {strides = array<i32>} : memref<2x16x896xbf16, #tpu.memory_space<vmem>>, vector<2x16x128xbf16>,
    %c0_149 = arith.constant 0 : index
    %c3_150 = arith.constant 3 : index
    %c0_151 = arith.constant 0 : index
    %112 = vector.load %arg16[%c0_149, %c3_150, %c0_151] : memref<2x22x128xbf16, #tpu.memory_space<vmem>>, vector<2x16x128xbf16>
    %c0_152 = arith.constant 0 : index
    %c0_153 = arith.constant 0 : index
    %c384_154 = arith.constant 384 : index
    %113 = vector.load %arg17[%c0_152, %c0_153, %c384_154] : memref<2x16x896xbf16, #tpu.memory_space<vmem>>, vector<2x16x128xbf16>
    tpu.vector_store %arg17[%c0_152, %c0_153, %c384_154], %112 {strides = array<i32>} : memref<2x16x896xbf16, #tpu.memory_space<vmem>>, vector<2x16x128xbf16>,
    %c0_155 = arith.constant 0 : index
    %c4_156 = arith.constant 4 : index
    %c0_157 = arith.constant 0 : index
    %114 = vector.load %arg16[%c0_155, %c4_156, %c0_157] : memref<2x22x128xbf16, #tpu.memory_space<vmem>>, vector<2x16x128xbf16>
    %c0_158 = arith.constant 0 : index
    %c0_159 = arith.constant 0 : index
    %c512 = arith.constant 512 : index
    %115 = vector.load %arg17[%c0_158, %c0_159, %c512] : memref<2x16x896xbf16, #tpu.memory_space<vmem>>, vector<2x16x128xbf16>
    tpu.vector_store %arg17[%c0_158, %c0_159, %c512], %114 {strides = array<i32>} : memref<2x16x896xbf16, #tpu.memory_space<vmem>>, vector<2x16x128xbf16>,
    %c0_160 = arith.constant 0 : index
    %c5_161 = arith.constant 5 : index
    %c0_162 = arith.constant 0 : index
    %116 = vector.load %arg16[%c0_160, %c5_161, %c0_162] : memref<2x22x128xbf16, #tpu.memory_space<vmem>>, vector<2x16x128xbf16>
    %c0_163 = arith.constant 0 : index
    %c0_164 = arith.constant 0 : index
    %c640 = arith.constant 640 : index
    %117 = vector.load %arg17[%c0_163, %c0_164, %c640] : memref<2x16x896xbf16, #tpu.memory_space<vmem>>, vector<2x16x128xbf16>
    tpu.vector_store %arg17[%c0_163, %c0_164, %c640], %116 {strides = array<i32>} : memref<2x16x896xbf16, #tpu.memory_space<vmem>>, vector<2x16x128xbf16>,
    %c0_165 = arith.constant 0 : index
    %c6_166 = arith.constant 6 : index
    %c0_167 = arith.constant 0 : index
    %118 = vector.load %arg16[%c0_165, %c6_166, %c0_167] : memref<2x22x128xbf16, #tpu.memory_space<vmem>>, vector<2x16x128xbf16>
    %c0_168 = arith.constant 0 : index
    %c0_169 = arith.constant 0 : index
    %c768 = arith.constant 768 : index
    %119 = vector.load %arg17[%c0_168, %c0_169, %c768] : memref<2x16x896xbf16, #tpu.memory_space<vmem>>, vector<2x16x128xbf16>
    tpu.vector_store %arg17[%c0_168, %c0_169, %c768], %118 {strides = array<i32>} : memref<2x16x896xbf16, #tpu.memory_space<vmem>>, vector<2x16x128xbf16>,
    %c0_170 = arith.constant 0 : index
    %c0_171 = arith.constant 0 : index
    %c0_172 = arith.constant 0 : index
    %120 = vector.load %arg17[%c0_170, %c0_171, %c0_172] : memref<2x16x896xbf16, #tpu.memory_space<vmem>>, vector<2x16x896xbf16>
    %121 = vector.shape_cast %120 : vector<2x16x896xbf16> to vector<32x896xbf16>
    %c0_173 = arith.constant 0 : index
    %c0_174 = arith.constant 0 : index
    %122 = vector.load %arg8[%c0_173, %c0_174] : memref<896x256xbf16, #tpu.memory_space<vmem>>, vector<896x256xbf16>
    %cst_175 = arith.constant dense<0.000000e+00> : vector<32x256xf32>
    %123 = tpu.matmul %121, %122, %cst_175 {dimension_numbers = #tpu.dot_dimension_numbers<[1], [0], [0], [1], [0, 0, 1, 1], [], []>} : vector<32x896xbf16>, vector<896x256xbf16>, vector<32x256xf32> -> vector<32x256xf32>
    %cst_176 = arith.constant dense<0.000000e+00> : vector<256xf32>
    %124 = vector.multi_reduction <add>, %123, %cst_176 [0] : vector<32x256xf32> to vector<256xf32>
    %125 = vector.shape_cast %124 : vector<256xf32> to vector<1x256xf32>
    %cst_177 = arith.constant 3.125000e-02 : f32
    %126 = vector.broadcast %cst_177 : f32 to vector<1x256xf32>
    %127 = arith.mulf %125, %126 : vector<1x256xf32>
    %128 = vector.broadcast %127 : vector<1x256xf32> to vector<32x256xf32>
    %129 = arith.subf %123, %128 : vector<32x256xf32>
    %130 = arith.mulf %129, %129 : vector<32x256xf32>
    %cst_178 = arith.constant dense<0.000000e+00> : vector<256xf32>
    %131 = vector.multi_reduction <add>, %130, %cst_178 [0] : vector<32x256xf32> to vector<256xf32>
    %132 = vector.shape_cast %131 : vector<256xf32> to vector<1x256xf32>
    %cst_179 = arith.constant 3.125000e-02 : f32
    %133 = vector.broadcast %cst_179 : f32 to vector<1x256xf32>
    %134 = arith.mulf %132, %133 : vector<1x256xf32>
    %cst_180 = arith.constant 9.99999974E-6 : f32
    %135 = vector.broadcast %cst_180 : f32 to vector<1x256xf32>
    %136 = arith.addf %134, %135 : vector<1x256xf32>
    %137 = math.rsqrt %136 : vector<1x256xf32>
    %c0_181 = arith.constant 0 : index
    %c0_182 = arith.constant 0 : index
    %138 = vector.load %arg9[%c0_181, %c0_182] : memref<1x256xf32, #tpu.memory_space<vmem>>, vector<1x256xf32>
    %139 = arith.mulf %137, %138 : vector<1x256xf32>
    %140 = vector.broadcast %139 : vector<1x256xf32> to vector<32x256xf32>
    %141 = arith.mulf %129, %140 : vector<32x256xf32>
    %c0_183 = arith.constant 0 : index
    %c0_184 = arith.constant 0 : index
    %142 = vector.load %arg10[%c0_183, %c0_184] : memref<1x256xf32, #tpu.memory_space<vmem>>, vector<1x256xf32>
    %143 = vector.broadcast %142 : vector<1x256xf32> to vector<32x256xf32>
    %144 = arith.addf %141, %143 : vector<32x256xf32>
    %cst_185 = arith.constant 0.000000e+00 : f32
    %145 = vector.broadcast %cst_185 : f32 to vector<32x256xf32>
    %146 = arith.cmpf oge, %144, %145 : vector<32x256xf32>
    %cst_186 = arith.constant 2.000000e-01 : f32
    %147 = vector.broadcast %cst_186 : f32 to vector<32x256xf32>
    %148 = arith.mulf %147, %144 : vector<32x256xf32>
    %149 = arith.select %146, %144, %148 : vector<32x256xi1>, vector<32x256xf32>
    %150 = vector.shape_cast %149 : vector<32x256xf32> to vector<2x16x256xf32>
    %c0_187 = arith.constant 0 : index
    %c0_188 = arith.constant 0 : index
    %c0_189 = arith.constant 0 : index
    %151 = vector.load %arg11[%c0_187, %c0_188, %c0_189] : memref<2x16x256xf32, #tpu.memory_space<vmem>>, vector<2x16x256xf32>
    tpu.vector_store %arg11[%c0_187, %c0_188, %c0_189], %150 {strides = array<i32>} : memref<2x16x256xf32, #tpu.memory_space<vmem>>, vector<2x16x256xf32>,
    return
  }
  func.func @transform_0(%arg0: i32) -> (i32, i32, i32) {
    %c0_i32 = arith.constant 0 : i32
    %c0_i32_0 = arith.constant 0 : i32
    %c0_i32_1 = arith.constant 0 : i32
    %c0_i32_2 = arith.constant 0 : i32
    return %c0_i32, %c0_i32_0, %c0_i32_1 : i32, i32, i32
  }
  func.func @transform_1(%arg0: i32) -> (i32, i32) {
    %c0_i32 = arith.constant 0 : i32
    %c0_i32_0 = arith.constant 0 : i32
    %c0_i32_1 = arith.constant 0 : i32
    return %c0_i32, %c0_i32_0 : i32, i32
  }
  func.func @transform_2(%arg0: i32) -> (i32, i32) {
    %c0_i32 = arith.constant 0 : i32
    %c0_i32_0 = arith.constant 0 : i32
    %c0_i32_1 = arith.constant 0 : i32
    return %c0_i32, %c0_i32_0 : i32, i32
  }
  func.func @transform_3(%arg0: i32) -> (i32, i32) {
    %c0_i32 = arith.constant 0 : i32
    %c0_i32_0 = arith.constant 0 : i32
    %c0_i32_1 = arith.constant 0 : i32
    return %c0_i32, %c0_i32_0 : i32, i32
  }
  func.func @transform_4(%arg0: i32) -> (i32, i32) {
    %c0_i32 = arith.constant 0 : i32
    %c0_i32_0 = arith.constant 0 : i32
    %c0_i32_1 = arith.constant 0 : i32
    return %c0_i32, %c0_i32_0 : i32, i32
  }
  func.func @transform_5(%arg0: i32) -> (i32, i32) {
    %c0_i32 = arith.constant 0 : i32
    %c0_i32_0 = arith.constant 0 : i32
    %c0_i32_1 = arith.constant 0 : i32
    return %c0_i32, %c0_i32_0 : i32, i32
  }
  func.func @transform_6(%arg0: i32) -> (i32, i32) {
    %c0_i32 = arith.constant 0 : i32
    %c0_i32_0 = arith.constant 0 : i32
    %c0_i32_1 = arith.constant 0 : i32
    return %c0_i32, %c0_i32_0 : i32, i32
  }
  func.func @transform_7(%arg0: i32) -> (i32, i32) {
    %c0_i32 = arith.constant 0 : i32
    %c0_i32_0 = arith.constant 0 : i32
    %c0_i32_1 = arith.constant 0 : i32
    return %c0_i32, %c0_i32_0 : i32, i32
  }
  func.func @transform_8(%arg0: i32) -> (i32, i32) {
    %c0_i32 = arith.constant 0 : i32
    %c0_i32_0 = arith.constant 0 : i32
    %c0_i32_1 = arith.constant 0 : i32
    return %c0_i32, %c0_i32_0 : i32, i32
  }
  func.func @transform_9(%arg0: i32) -> (i32, i32) {
    %c0_i32 = arith.constant 0 : i32
    %c0_i32_0 = arith.constant 0 : i32
    %c0_i32_1 = arith.constant 0 : i32
    return %c0_i32, %c0_i32_0 : i32, i32
  }
  func.func @transform_10(%arg0: i32) -> (i32, i32, i32) {
    %c0_i32 = arith.constant 0 : i32
    %c0_i32_0 = arith.constant 0 : i32
    %c0_i32_1 = arith.constant 0 : i32
    %c0_i32_2 = arith.constant 0 : i32
    return %c0_i32, %c0_i32_0, %c0_i32_1 : i32, i32, i32
  }
}

</mosaic_0001>

<bundles_post_ra>
// kernel: encoder_forward.1
= control target key start
LH: loop header
LB: loop body
LE: loop exit
PB: predicated region body
PF: predicated region fallthrough
CT: control target
= control target key end

     0   :  { %15 = vsyncpa [#allocation9], 0  ;;  %s3894_s0 = inlined_call_operand.vmem [shape: f32[2,16,4], index: 0, kind: input, shape index: {}]   ;;  %s3895_s1 = inlined_call_operand.vmem [shape: bf16[28,64], index: 1, kind: input, shape index: {}]   ;;  %s3896_s2 = inlined_call_operand.vmem [shape: f32[1,64], index: 2, kind: input, shape index: {}]   ;;  %s3897_s3 = inlined_call_operand.vmem [shape: f32[1,64], index: 3, kind: input, shape index: {}]   ;;  %s3898_s4 = inlined_call_operand.hbm [shape: bf16[448,128], index: 4, kind: input, shape index: {}]   ;;  %s3899_s5 = inlined_call_operand.vmem [shape: f32[1,128], index: 5, kind: input, shape index: {}]   ;;  %s3900_s6 = inlined_call_operand.vmem [shape: f32[1,128], index: 6, kind: input, shape index: {}]   ;;  %s3901_s7 = inlined_call_operand.hbm [shape: bf16[896,256], index: 7, kind: input, shape index: {}]   ;;  %s3902_s8 = inlined_call_operand.vmem [shape: f32[1,256], index: 8, kind: input, shape index: {}]   ;;  %s3903_s9 = inlined_call_operand.vmem [shape: f32[1,256], index: 9, kind: input, shape index: {}]   ;;  %s3904_s10 = inlined_call_operand.hbm [shape: f32[2,16,256], index: 10, kind: output, shape index: {}]  }
   0x1   :  { %16 = vsyncpa [#allocation12], 0 }
   0x2   :  { %17 = vsyncpa [#allocation10], 0  ;;  %s3531_s13 = smov [#allocation8]   ;;  %s3459_s17 = scalar_lea.hbm %s3898_s4, 3584 }
   0x3   :  { %s31_s14 = sshll.u32 %s3531_s13, 4  ;;  %p3460_p0 = scmp.ne.s32.totalorder %s3898_s4, %s3459_s17  ;;  %s32_s14 = int_to_ptr.vmem [resolvable:$true] %s31_s14 }
   0x4   :  { %p3463_p1 = scmp.lt.u32.totalorder %s3459_s17, %s3898_s4 }
   0x6   :  { %p3465_p2 = pnand %p3463_p1, %p3460_p0 }
   0x8   :  { %3468 = shalt.err (!%p3465_p2)
}
   0x9   :  { %s3469_s22 = scalar_lea.vmem %s32_s14, 3584  ;;  %p3474_p4 = scmp.lt.s32.totalorder %s32_s14, %s32_s14 }
   0xa   :  { %p3470_p3 = scmp.ne.s32.totalorder %s32_s14, %s3469_s22  ;;  %p3475_p5 = scmp.lt.s32.totalorder %s3469_s22, %s3469_s22 }
   0xc   :  { %p3476_p6 = por %p3475_p5, %p3474_p4 }
   0xe   :  { %p3477_p7 = pnand %p3476_p6, %p3470_p3 }
  0x10   :  { %3480 = shalt.err (!%p3477_p7)
}
  0x11   :  { %s3532_s23 = smov 64   ;;  %s3533_s24 = smov 4  }
  0x12   :  { %37 = dma.hbm_to_vmem [thread:$0]  %s3898_s4, 3584, %s32_s14, [#allocation9], %s3532_s23, %s3532_s23, %s3533_s24  }
  0x13   :  { %s3534_s27 = smov [#allocation11]   ;;  %s3481_s11 = scalar_lea.hbm %s3901_s7, 14336 }
  0x14   :  { %s47_s28 = sshll.u32 %s3534_s27, 4  ;;  %p3482_p8 = scmp.ne.s32.totalorder %s3901_s7, %s3481_s11  ;;  %s48_s28 = int_to_ptr.vmem [resolvable:$true] %s47_s28 }
  0x15   :  { %p3485_p9 = scmp.lt.u32.totalorder %s3481_s11, %s3901_s7 }
  0x17   :  { %p3487_p10 = pnand %p3485_p9, %p3482_p8 }
  0x19   :  { %3490 = shalt.err (!%p3487_p10)
}
  0x1a   :  { %s3491_s17 = scalar_lea.vmem %s48_s28, 14336  ;;  %p3496_p12 = scmp.lt.s32.totalorder %s48_s28, %s48_s28 }
  0x1b   :  { %p3492_p11 = scmp.ne.s32.totalorder %s48_s28, %s3491_s17  ;;  %p3497_p13 = scmp.lt.s32.totalorder %s3491_s17, %s3491_s17 }
  0x1d   :  { %p3498_p0 = por %p3497_p13, %p3496_p12 }
  0x1f   :  { %p3499_p1 = pnand %p3498_p0, %p3492_p11 }
  0x21   :  { %3502 = shalt.err (!%p3499_p1)
}
  0x22   :  { %s3535_s4 = smov 128   ;;  %s3536_s14 = smov 8  }
  0x23   :  { %53 = dma.hbm_to_vmem [thread:$0]  %s3901_s7, 14336, %s48_s28, [#allocation12], %s3535_s4, %s3535_s4, %s3536_s14  }
  0x24   :  { %3525 = dma.done.wait [#allocation9], 3584  }
  0x25   :  { %3526 = vsyncadd [#allocation9], 4294963712 }
  0x26   :  { %3527 = dma.done.wait [#allocation12], 14336  }
  0x27   :  { %3528 = vsyncadd [#allocation12], 4294952960  ;;  %vm69_vm0 = vcmask 25600   ;;  %vm70_vm1 = vsmask.f32 1280  ;;  %vm78_vm2 = vcmask 26625  }
  0x28   :  { %vm79_vm3 = vsmask.f32 7942  ;;  %vm3628_vm4 = vmand %vm69_vm0, %vm70_vm1  ;;  %vm99_vm6 = vsmask.f32 5392  ;;  %v65_v2 = vld [vmem:[%s3894_s0] sm:$0xff]  ;;  %v66_v3 = vld [vmem:[%s3894_s0 + $0x8] sm:$0xff] }
  0x29   :  { %vm3633_vm5 = vmand %vm78_vm2, %vm79_vm3  ;;  %v72_v4 = vld [vmem:[#allocation2] sm:$0x3]  ;;  %vm145_vm7 = vcmask 27649   ;;  %v81_v6 = vld [vmem:[#allocation2 + $0x8] sm:$0x6]  ;;  %v3085_v7 = vpack.c.bf16 %v65_v2, %v65_v2  ;;  %v3086_v8 = vpack.c.bf16 %v66_v3, %v66_v3  ;;  %vm150_vm8 = vcmask 27648  }
  0x2a   :  { %v73_v5 = vsel %vm3628_vm4, 0, %v72_v4  ;;  %v67_v9 = vld [vmem:[%s3894_s0 + $0x10] sm:$0xff]  ;;  %v68_v10 = vld [vmem:[%s3894_s0 + $0x18] sm:$0xff]  ;;  %v82_v11 = vsel %vm3633_vm5, 0, %v81_v6  ;;  %v75_v12 = vld [vmem:[#allocation2 + $0xc] sm:$0x3] }
  0x2b   :  { %74 = vst [vmem:[#allocation2] sm:$0x3] %v73_v5  ;;  %v84_v13 = vld [vmem:[#allocation2 + $0x14] sm:$0x6]  ;;  %v3087_v14 = vpack.c.bf16 %v67_v9, %v67_v9  ;;  %v3088_v15 = vpack.c.bf16 %v68_v10, %v68_v10  ;;  %83 = vst [vmem:[#allocation2 + $0x8] sm:$0x6] %v82_v11 }
  0x2c   :  { %v102_v16 = vshrl.u32 %v3085_v7, 16  ;;  %v105_v17 = vshll.u32 %v3085_v7, 16  ;;  %v111_v18 = vshrl.u32 %v3086_v8, 16  ;;  %v114_v19 = vshll.u32 %v3086_v8, 16  ;;  %vm3659_vm9 = vmand %vm145_vm7, %vm79_vm3  ;;  %s3537_s0 = smov 16   ;;  %s3538_s29 = smov 12  }
  0x2d   :  { %v76_v20 = vsel %vm3628_vm4, 0, %v75_v12  ;;  %v85_v21 = vsel %vm3633_vm5, 0, %v84_v13  ;;  %v121_v22 = vshrl.u32 %v3087_v14, 16  ;;  %v124_v23 = vshll.u32 %v3087_v14, 16  ;;  %vm3665_vm10 = vmor %vm70_vm1, %vm99_vm6  ;;  %s3539_s11 = smov 20   ;;  %s3540_s15 = smov 24  }
  0x2e   :  { %v104_v24 = vrot.slane %v102_v16, 6  ;;  %v107_v25 = vrot.slane %v105_v17, 7  ;;  %v113_v26 = vrot.slane %v111_v18, 6  ;;  %v116_v27 = vrot.slane %v114_v19, 7  ;;  %77 = vst [vmem:[#allocation2 + $0xc] sm:$0x3] %v76_v20 }
  0x2f   :  { %86 = vst [vmem:[#allocation2 + $0x14] sm:$0x6] %v85_v21  ;;  %v123_v29 = vrot.slane %v121_v22, 6  ;;  %v126_v30 = vrot.slane %v124_v23, 7  ;;  %v130_v31 = vshrl.u32 %v3088_v15, 16  ;;  %v133_v32 = vshll.u32 %v3088_v15, 16 }
  0x30   :  { %v108_v33 = vor.u32 %v107_v25, %v104_v24  ;;  %v117_v34 = vor.u32 %v116_v27, %v113_v26  ;;  %vm363_vm11 = vcmask 1045504   ;;  %vm259_vm12 = vcmask 1046528  }
  0x31   :  { %v127_v36 = vor.u32 %v126_v30, %v123_v29  ;;  %v132_v37 = vrot.slane %v130_v31, 6  ;;  %v135_v38 = vrot.slane %v133_v32, 7  ;;  %vm178_vm13 = vcmask 31744  }
  0x32   :  { %v109_v39 = vrot.slane %v108_v33, 4  ;;  %v119_v40 = vrot.slane %v117_v34, 4  ;;  %v147_v41 = vld [vmem:[#allocation2] sm:$0xe]  ;;  %v152_v43 = vld [vmem:[#allocation2 + $0x8] sm:$0x3] }
  0x33   :  { %v148_v42 = vsel %vm3659_vm9, %v108_v33, %v147_v41  ;;  %v128_v44 = vrot.slane %v127_v36, 4  ;;  %v136_v45 = vor.u32 %v135_v38, %v132_v37  ;;  %vm203_vm14 = vsmask.f32 7424 }
  0x34   :  { %v118_v46 = vsel %vm3665_vm10, %v109_v39, %v117_v34  ;;  %149 = vst [vmem:[#allocation2] sm:$0xe] %v148_v42  ;;  %v153_v47 = vsel %vm3628_vm4, %v119_v40, %v152_v43  ;;  %vm297_vm15 = vsmask.f32 6400  ;;  %vm401_vm0 = vsmask.f32 5376 }
  0x35   :  { %151 = vst.msk [vmem:[#allocation2 + $0x4] sm:$0xf] %vm150_vm8, %v118_v46  ;;  %154 = vst [vmem:[#allocation2 + $0x8] sm:$0x3] %v153_v47  ;;  %v137_v48 = vsel %vm3665_vm10, %v128_v44, %v136_v45  ;;  %v138_v49 = vrot.slane %v136_v45, 4  ;;  %vm467_vm2 = vcmask 1044480  }
  0x36   :  { %v155_v50 = vld [vmem:[#allocation2 + $0xc] sm:$0xe]  ;;  %v159_v51 = vld [vmem:[#allocation2 + $0x14] sm:$0x3]  ;;  %158 = vst.msk [vmem:[#allocation2 + $0x10] sm:$0xf] %vm150_vm8, %v137_v48 }
  0x37   :  { %v156_v52 = vsel %vm3659_vm9, %v127_v36, %v155_v50  ;;  %v160_v53 = vsel %vm3628_vm4, %v138_v49, %v159_v51  ;;  %vm234_vm4 = vcmask 64544   ;;  %vm272_vm5 = vcmask 97344  }
  0x38   :  { %157 = vst [vmem:[#allocation2 + $0xc] sm:$0xe] %v156_v52  ;;  %161 = vst [vmem:[#allocation2 + $0x14] sm:$0x3] %v160_v53  ;;  %vm338_vm6 = vcmask 130144   ;;  %vm376_vm7 = vcmask 162944  }
  0x39   :  { %vm442_vm8 = vcmask 195744   ;;  %vm480_vm9 = vcmask 228544  }
  0x3c   :  { %v3175_v54 = vld [vmem:[#allocation2] sm:$0xfc]   ;;  %v3176_v55 = vld [vmem:[#allocation2 + $0x8] ss:$0 sps:$4 sm:$0x33]  }
  0x3d   :  { %v3181_v56 = vld [vmem:[#allocation2] sm:$0xff]   ;;  %v364_v57 = vrot.slane %v3175_v54, 2  ;;  %v365_v60 = vrot.slane %v3176_v55, 2  ;;  %v3178_v61 = vld [vmem:[#allocation2 + $0x8] ss:$0 sps:$4 sm:$0x11]  }
  0x3e   :  { %v3177_v58 = vld [vmem:[#allocation2] sm:$0xfe]   ;;  %v205_v63 = vshrl.u32 %v3181_v56, 16  ;;  %v261_v2 = vrot.slane %v3178_v61, 1  ;;  %v207_v4 = vshll.u32 %v3181_v56, 16 }
  0x3f   :  { %v3185_v59 = vld [vmem:[#allocation2 + $0xc] sm:$0xff]   ;;  %v260_v62 = vrot.slane %v3177_v58, 1  ;;  %v366_v1 = vsel %vm363_vm11, %v364_v57, %v365_v60  ;;  %v3180_v0 = vld [vmem:[#allocation2 + $0x14] ss:$0 sps:$4 sm:$0x11]   ;;  %v3199_v12 = vld [vmem:[#allocation2] sm:$0xff]  }
  0x40   :  { %v3179_v3 = vld [vmem:[#allocation2 + $0xc] sm:$0xfe]   ;;  %370 = vrot.lane.b32.xlu0 %v366_v1, %s3537_s0  ;;  %v217_v5 = vshrl.u32 %v3185_v59, 16  ;;  %v264_v8 = vrot.slane %v3180_v0, 1  ;;  %v219_v10 = vshll.u32 %v3185_v59, 16  ;;  %v209_v11 = vrot.slane %v207_v4, 1 }
  0x41   :  { %v262_v6 = vsel %vm259_vm12, %v260_v62, %v261_v2  ;;  %v263_v7 = vrot.slane %v3179_v3, 1  ;;  %v3182_v9 = vld [vmem:[#allocation2 + $0x8] ss:$0 sps:$4 sm:$0x11]   ;;  %v3183_v15 = vld [vmem:[#allocation2 + $0xc] sm:$0xfc]  }
  0x42   :  { %266 = vrot.lane.b32.xlu1 %v262_v6, %s3536_s14  ;;  %v212_v14 = vshll.u32 %v3182_v9, 16  ;;  %v221_v16 = vrot.slane %v219_v10, 1  ;;  %v210_v17 = vor.u32 %v209_v11, %v205_v63  ;;  %v3184_v18 = vld [vmem:[#allocation2 + $0x14] ss:$0 sps:$4 sm:$0x33]   ;;  %179 = vst.msk [vmem:[#allocation3] sm:$0xff] %vm178_vm13, %v3199_v12 }
  0x43   :  { %v265_v13 = vsel %vm259_vm12, %v263_v7, %v264_v8  ;;  %v3200_v19 = vld [vmem:[#allocation2 + $0xc] sm:$0xff]   ;;  %v367_v21 = vrot.slane %v3183_v15, 2  ;;  %v368_v22 = vrot.slane %v3184_v18, 2  ;;  %v3186_v23 = vld [vmem:[#allocation2 + $0x14] ss:$0 sps:$4 sm:$0x11]  }
  0x44   :  { %v214_v20 = vrot.slane %v212_v14, 1  ;;  %180 = vst.msk [vmem:[#allocation3 + $0x8] sm:$0xff] %vm178_vm13, %v3200_v19  ;;  %v3187_v25 = vld [vmem:[#allocation2 + $0xc] sm:$0xfe]   ;;  %v222_v27 = vor.u32 %v221_v16, %v217_v5  ;;  %v224_v28 = vshll.u32 %v3186_v23, 16  ;;  %v3201_v6 = vld [vmem:[%s3895_s1] sm:$0xff]  }
  0x45   :  { %v369_v26 = vsel %vm363_vm11, %v367_v21, %v368_v22  ;;  %v3188_v29 = vld [vmem:[#allocation2 + $0x14] ss:$0 sps:$4 sm:$0x33]   ;;  %v316_v30 = vshrl.u32 %v3187_v25, 16  ;;  %v319_v31 = vshll.u32 %v3187_v25, 16  ;;  %3129 = vmatprep.subr.bf16.mxu0 %v3201_v6  ;;  %vm500_vm13 = vcmask 228352  }
  0x46   :  { %268 = vrot.lane.b32.xlu1 %v265_v13, %s3536_s14  ;;  %v215_v24 = vsel %vm203_vm14, %v210_v17, %v214_v20  ;;  %v226_v32 = vrot.slane %v224_v28, 1  ;;  %v324_v33 = vshrl.u32 %v3188_v29, 16  ;;  %v327_v34 = vshll.u32 %v3188_v29, 16  ;;  %v3189_v36 = vld [vmem:[#allocation2] sm:$0xfe]   ;;  %3130 = vmatpush3.bf16.msra.mxu0 %v3201_v6 }
  0x47   :  { %228 = vrot.lane.b32.xlu0 %v215_v24, %s3533_s24  ;;  %v318_v37 = vrot.slane %v316_v30, 1  ;;  %v321_v38 = vrot.slane %v319_v31, 2  ;;  %v3190_v39 = vld [vmem:[#allocation2 + $0x8] ss:$0 sps:$4 sm:$0x33]   ;;  %v299_v43 = vshrl.u32 %v3189_v36, 16 }
  0x48   :  { %v227_v40 = vsel %vm203_vm14, %v222_v27, %v226_v32  ;;  %v326_v41 = vrot.slane %v324_v33, 1  ;;  %v329_v42 = vrot.slane %v327_v34, 2  ;;  %v302_v45 = vshll.u32 %v3189_v36, 16  ;;  %v3191_v50 = vld [vmem:[#allocation2] sm:$0xfc]  }
  0x49   :  { %v322_v44 = vor.u32 %v321_v38, %v318_v37  ;;  %v307_v46 = vshrl.u32 %v3190_v39, 16  ;;  %v310_v47 = vshll.u32 %v3190_v39, 16  ;;  %v301_v49 = vrot.slane %v299_v43, 1  ;;  %v3192_v54 = vld [vmem:[#allocation2 + $0x8] ss:$0 sps:$4 sm:$0x77]  }
  0x4a   :  { %372 = vrot.lane.b32.xlu1 %v369_v26, %s3537_s0  ;;  %v330_v48 = vor.u32 %v329_v42, %v326_v41  ;;  %v304_v51 = vrot.slane %v302_v45, 2  ;;  %v403_v56 = vshrl.u32 %v3191_v50, 16  ;;  %v406_v57 = vshll.u32 %v3191_v50, 16  ;;  %v3193_v62 = vld [vmem:[#allocation2 + $0xc] sm:$0xfc]  }
  0x4b   :  { %230 = vrot.lane.b32.xlu0 %v227_v40, %s3533_s24  ;;  %v309_v52 = vrot.slane %v307_v46, 1  ;;  %v312_v53 = vrot.slane %v310_v47, 2  ;;  %v411_v60 = vshrl.u32 %v3192_v54, 16  ;;  %v414_v61 = vshll.u32 %v3192_v54, 16  ;;  %v3195_v13 = vld [vmem:[#allocation2] sm:$0xf8]  }
  0x4c   :  { %v331_v55 = vsel %vm297_vm15, %v322_v44, %v330_v48  ;;  %v305_v58 = vor.u32 %v304_v51, %v301_v49  ;;  %v405_v63 = vrot.slane %v403_v56, 2  ;;  %v408_v1 = vrot.slane %v406_v57, 3  ;;  %v3194_v2 = vld [vmem:[#allocation2 + $0x14] ss:$0 sps:$4 sm:$0x77]   ;;  %v3215_v56 = vld [vmem:[#allocation8 + $0x40] sm:$0xff]  }
  0x4d   :  { %v313_v59 = vor.u32 %v312_v53, %v309_v52  ;;  %v413_v0 = vrot.slane %v411_v60, 2  ;;  %v416_v4 = vrot.slane %v414_v61, 3  ;;  %v420_v5 = vshrl.u32 %v3193_v62, 16  ;;  %v3196_v17 = vld [vmem:[#allocation2 + $0x8] ss:$0 sps:$4 sm:$0x77]  }
  0x4e   :  { %334 = vrot.lane.b32.xlu1 %v331_v55, %s3538_s29  ;;  %v409_v7 = vor.u32 %v408_v1, %v405_v63  ;;  %v423_v8 = vshll.u32 %v3193_v62, 16  ;;  %v428_v9 = vshrl.u32 %v3194_v2, 16  ;;  %v431_v10 = vshll.u32 %v3194_v2, 16  ;;  %v3197_v23 = vld [vmem:[#allocation2 + $0xc] sm:$0xf8]   ;;  %v3216_v57 = vld [vmem:[#allocation8] sm:$0xff]  }
  0x4f   :  { %v314_v3 = vsel %vm297_vm15, %v305_v58, %v313_v59  ;;  %v417_v11 = vor.u32 %v416_v4, %v413_v0  ;;  %v422_v12 = vrot.slane %v420_v5, 2  ;;  %v468_v19 = vrot.slane %v3195_v13, 3  ;;  %v3198_v24 = vld [vmem:[#allocation2 + $0x14] ss:$0 sps:$4 sm:$0x77]   ;;  %v3217_v58 = vld [vmem:[#allocation8 + $0x48] sm:$0xff]  }
  0x50   :  { %332 = vrot.lane.b32.xlu0 %v314_v3, %s3538_s29  ;;  %v425_v14 = vrot.slane %v423_v8, 3  ;;  %v430_v15 = vrot.slane %v428_v9, 2  ;;  %v433_v16 = vrot.slane %v431_v10, 3  ;;  %v469_v22 = vrot.slane %v3196_v17, 3  ;;  %v3202_v29 = vld [vmem:[%s3895_s1 + $0x8] sm:$0x3f]  }
  0x51   :  { %v418_v18 = vsel %vm401_vm0, %v409_v7, %v417_v11  ;;  %v471_v27 = vrot.slane %v3197_v23, 3  ;;  %v472_v28 = vrot.slane %v3198_v24, 3  ;;  %3161 = vmatprep.subr.msk.bf16.mxu0 %vm363_vm11, %v3202_v29  ;;  %v509_v31 = vsel %vm363_vm11, %v3202_v29, 0  ;;  %v634_v48 = vld [vmem:[#allocation4] sm:$0x3]  ;;  %v3218_v59 = vld [vmem:[#allocation8 + $0x8] sm:$0xff]  }
  0x52   :  { %v426_v20 = vor.u32 %v425_v14, %v422_v12  ;;  %v434_v21 = vor.u32 %v433_v16, %v430_v15  ;;  %v470_v26 = vsel %vm467_vm2, %v468_v19, %v469_v22  ;;  %3132 = vmatpush3.bf16.msra.mxu0 %v509_v31  ;;  %v637_v49 = vld [vmem:[#allocation4 + $0xc] sm:$0x3]  ;;  %v642_v52 = vld [vmem:[#allocation4 + $0x8] sm:$0x6]  ;;  %v645_v53 = vld [vmem:[#allocation4 + $0x14] sm:$0x6] }
  0x53   :  { %v473_v30 = vsel %vm467_vm2, %v471_v27, %v472_v28  ;;  %3101 = vmatprep.subr.bf16.mxu0 %v3215_v56  ;;  %v3219_v60 = vld [vmem:[#allocation8 + $0x50] sm:$0xff]   ;;  %v3221_v62 = vld [vmem:[#allocation8 + $0x58] sm:$0xff]   ;;  %v3223_v3 = vld [vmem:[#allocation8 + $0x60] sm:$0xff]  }
  0x54   :  { %436 = vrot.lane.b32.xlu0 %v418_v18, %s3539_s11  ;;  %v435_v25 = vsel %vm401_vm0, %v426_v20, %v434_v21  ;;  %v3220_v61 = vld [vmem:[#allocation8 + $0x10] sm:$0xff]   ;;  %v3222_v1 = vld [vmem:[#allocation8 + $0x18] sm:$0xff]   ;;  %v3224_v7 = vld [vmem:[#allocation8 + $0x20] sm:$0xff]  }
  0x55   :  { %438 = vrot.lane.b32.xlu1 %v435_v25, %s3539_s11  ;;  %v3225_v9 = vld [vmem:[#allocation8 + $0x68] sm:$0xff]  }
  0x56   :  { %v3226_v13 = vld [vmem:[#allocation8 + $0x28] sm:$0xff]  }
  0x58   :  { %474 = vrot.lane.b32.xlu0 %v470_v26, %s3540_s15 }
  0x59   :  { %476 = vrot.lane.b32.xlu1 %v473_v30, %s3540_s15 }
  0xb2   :  { %v371_v32 = vpop.permute.xlu0 %370 }
  0xb4   :  { %v267_v33 = vpop.permute.xlu1 %266 }
  0xb8   :  { %v269_v34 = vpop.permute.xlu1 %268 }
  0xb9   :  { %v229_v36 = vpop.permute.xlu0 %228 }
  0xba   :  { %235 = vst.msk [vmem:[#allocation3] sm:$0xff] %vm234_vm4, %v229_v36 }
  0xbb   :  { %273 = vst.msk [vmem:[#allocation3] sm:$0xff] %vm272_vm5, %v267_v33 }
  0xbc   :  { %v373_v37 = vpop.permute.xlu1 %372 }
  0xbd   :  { %v231_v38 = vpop.permute.xlu0 %230 }
  0xbe   :  { %236 = vst.msk [vmem:[#allocation3 + $0x8] sm:$0xff] %vm234_vm4, %v231_v38  ;;  %vm632_vm4 = vcmask 517120  }
  0xbf   :  { %274 = vst.msk [vmem:[#allocation3 + $0x8] sm:$0xff] %vm272_vm5, %v269_v34  ;;  %vm3712_vm5 = vmand %vm632_vm4, %vm70_vm1 }
  0xc0   :  { %v335_v39 = vpop.permute.xlu1 %334  ;;  %v635_v50 = vsel %vm3712_vm5, 0, %v634_v48  ;;  %v638_v51 = vsel %vm3712_vm5, 0, %v637_v49  ;;  %v599_v49 = vld [vmem:[%s3896_s2] sm:$0x1] }
  0xc1   :  { %340 = vst.msk [vmem:[#allocation3 + $0x8] sm:$0xff] %vm338_vm6, %v335_v39  ;;  %636 = vst [vmem:[#allocation4] sm:$0x3] %v635_v50 }
  0xc2   :  { %378 = vst.msk [vmem:[#allocation3 + $0x8] sm:$0xff] %vm376_vm7, %v373_v37  ;;  %v333_v40 = vpop.permute.xlu0 %332  ;;  %639 = vst [vmem:[#allocation4 + $0xc] sm:$0x3] %v638_v51 }
  0xc3   :  { %339 = vst.msk [vmem:[#allocation3] sm:$0xff] %vm338_vm6, %v333_v40  ;;  %vm640_vm6 = vcmask 518145  }
  0xc4   :  { %377 = vst.msk [vmem:[#allocation3] sm:$0xff] %vm376_vm7, %v371_v32  ;;  %vm641_vm7 = vmand %vm640_vm6, %vm79_vm3 }
  0xc5   :  { %v643_v54 = vsel %vm641_vm7, 0, %v642_v52  ;;  %v646_v55 = vsel %vm641_vm7, 0, %v645_v53  ;;  %vm704_vm7 = vcmask 519169  }
  0xc6   :  { %v437_v41 = vpop.permute.xlu0 %436  ;;  %644 = vst [vmem:[#allocation4 + $0x8] sm:$0x6] %v643_v54  ;;  %647 = vst [vmem:[#allocation4 + $0x14] sm:$0x6] %v646_v55  ;;  %v2881_v54 = vld [vmem:[%s3897_s3] ss:$0 sm:$0xff] }
  0xc7   :  { %443 = vst.msk [vmem:[#allocation3] sm:$0xff] %vm442_vm8, %v437_v41  ;;  %v439_v42 = vpop.permute.xlu1 %438 }
  0xc8   :  { %444 = vst.msk [vmem:[#allocation3 + $0x8] sm:$0xff] %vm442_vm8, %v439_v42  ;;  %vm560_vm8 = vcmask 523264  }
  0xca   :  { %v475_v43 = vpop.permute.xlu0 %474 }
  0xcb   :  { %481 = vst.msk [vmem:[#allocation3] sm:$0xff] %vm480_vm9, %v475_v43  ;;  %v477_v44 = vpop.permute.xlu1 %476 }
  0xcc   :  { %482 = vst.msk [vmem:[#allocation3 + $0x8] sm:$0xff] %vm480_vm9, %v477_v44 }
  0xd2   :  { %v483_v45 = vld [vmem:[#allocation3] sm:$0xff] }
  0xd3   :  { %3133 = vmatprep.mubr.msk.bf16.mxu0 %vm500_vm13, %v483_v45  ;;  %v484_v46 = vld [vmem:[#allocation3 + $0x8] sm:$0xff] }
  0xd4   :  { %3134 = vmatmul.mubr.msk.bf16.vlgmr.msra.gmra.mrb[0].mxu0 %vm500_vm13, %v484_v46  ;;  %v601_v46 = vlaneseq }
  0xd5   :  { %3102 = vmatpush3.bf16.msra.mxu0 %v3216_v57 }
  0xd6   :  { %3103 = vmatprep.subr.bf16.mxu0 %v3217_v58  ;;  %v3729_v48 = vshrl.u32 %v601_v46, 7 }
  0xd8   :  { %v3735_v50 = vsub.s32 0, %v3729_v48 }
  0xd9   :  { %3104 = vmatpush3.bf16.msra.mxu0 %v3218_v59 }
  0xda   :  { %3105 = vmatprep.subr.bf16.mxu0 %v3219_v60 }
  0xdd   :  { %3106 = vmatpush3.bf16.msra.mxu0 %v3220_v61 }
  0xde   :  { %3107 = vmatprep.subr.bf16.mxu0 %v3221_v62 }
  0xe1   :  { %3108 = vmatpush3.bf16.msra.mxu0 %v3222_v1 }
  0xe2   :  { %3109 = vmatprep.subr.bf16.mxu0 %v3223_v3 }
  0xe5   :  { %3110 = vmatpush3.bf16.msra.mxu0 %v3224_v7 }
  0xe6   :  { %3111 = vmatprep.subr.bf16.mxu0 %v3225_v9 }
  0xe9   :  { %3112 = vmatpush3.bf16.msra.mxu0 %v3226_v13 }
 0x1a7   :  { %v3135_v63 = vpop.f32.mrb[0].mxu0 }
 0x1a8   :  { %v545_v2 = vpop.f32.mrb[1].mxu0  ;;  %v564_v10 = vsel %vm560_vm8, %v3135_v63, 0.0 }
 0x1a9   :  { %v3136_v0 = vpop.f32.mrb[2].mxu0  ;;  %v561_v5 = vsel %vm560_vm8, %v545_v2, 0.0 }
 0x1aa   :  { %v548_v4 = vpop.f32.mrb[3].mxu0  ;;  %v566_v12 = vsel %vm560_vm8, %v3136_v0, 0.0 }
 0x1ab   :  { %v562_v6 = vsel %vm560_vm8, %v548_v4, 0.0 }
 0x1ac   :  { %v563_v8 = vadd.f32 %v562_v6, %v561_v5 }
 0x1ae   :  { %v565_v11 = vadd.f32 %v564_v10, %v563_v8 }
 0x1b0   :  { %v567_v14 = vadd.f32 %v566_v12, %v565_v11 }
 0x1b2   :  { %v568_v15 = vrot.slane %v567_v14, 4 }
 0x1b4   :  { %v569_v16 = vadd.f32 %v568_v15, %v567_v14 }
 0x1b6   :  { %v570_v17 = vrot.slane %v569_v16, 2 }
 0x1b8   :  { %v571_v18 = vadd.f32 %v570_v17, %v569_v16 }
 0x1ba   :  { %v572_v19 = vrot.slane %v571_v18, 1 }
 0x1bc   :  { %v573_v20 = vadd.f32 %v572_v19, %v571_v18 }
 0x1be   :  { %v574_v21 = vmul.f32 0.03125, %v573_v20 }
 0x1c0   :  { %v575_v22 = vsub.f32 %v545_v2, %v574_v21  ;;  %v576_v23 = vsub.f32 %v548_v4, %v574_v21  ;;  %v577_v24 = vsub.f32 %v3135_v63, %v574_v21  ;;  %v578_v25 = vsub.f32 %v3136_v0, %v574_v21 }
 0x1c2   :  { %v579_v26 = vmul.f32 %v575_v22, %v575_v22  ;;  %v580_v27 = vmul.f32 %v576_v23, %v576_v23  ;;  %v581_v28 = vmul.f32 %v577_v24, %v577_v24  ;;  %v582_v29 = vmul.f32 %v578_v25, %v578_v25 }
 0x1c4   :  { %v583_v30 = vsel %vm560_vm8, %v579_v26, 0.0  ;;  %v584_v31 = vsel %vm560_vm8, %v580_v27, 0.0  ;;  %v586_v33 = vsel %vm560_vm8, %v581_v28, 0.0  ;;  %v588_v36 = vsel %vm560_vm8, %v582_v29, 0.0  ;;  %v706_v28 = vld [vmem:[#allocation4] sm:$0xe] }
 0x1c5   :  { %v585_v32 = vadd.f32 %v584_v31, %v583_v30  ;;  %v714_v31 = vld [vmem:[#allocation4 + $0xc] sm:$0xe] }
 0x1c7   :  { %v587_v34 = vadd.f32 %v586_v33, %v585_v32 }
 0x1c9   :  { %v589_v37 = vadd.f32 %v588_v36, %v587_v34  ;;  %v711_v34 = vld [vmem:[#allocation4 + $0x8] sm:$0x3] }
 0x1cb   :  { %v590_v38 = vrot.slane %v589_v37, 4 }
 0x1cd   :  { %v591_v39 = vadd.f32 %v590_v38, %v589_v37 }
 0x1cf   :  { %v592_v40 = vrot.slane %v591_v39, 2 }
 0x1d1   :  { %v593_v41 = vadd.f32 %v592_v40, %v591_v39  ;;  %v718_v39 = vld [vmem:[#allocation4 + $0x14] sm:$0x3] }
 0x1d3   :  { %v594_v42 = vrot.slane %v593_v41, 1 }
 0x1d5   :  { %v595_v43 = vadd.f32 %v594_v42, %v593_v41 }
 0x1d7   :  { %v596_v44 = vmul.f32 0.03125, %v595_v43 }
 0x1d9   :  { %v597_v45 = vadd.f32 1e-05, %v596_v44 }
 0x1db   :  { %3451 = vrsqrt.f32 %v597_v45 }
 0x1e5   :  { %v3452_v51 = vpop.eup %3451 }
 0x1e6   :  { %v600_v52 = vmul.f32 %v3452_v51, %v599_v49 }
 0x1e8   :  { %v604_v53 = vrot.slane %v600_v52, %v3735_v50 }
 0x1ea   :  { %v605_v55 = vmul.f32 %v604_v53, %v575_v22  ;;  %v606_v56 = vmul.f32 %v604_v53, %v576_v23  ;;  %v607_v57 = vmul.f32 %v604_v53, %v577_v24  ;;  %v608_v58 = vmul.f32 %v604_v53, %v578_v25 }
 0x1ec   :  { %v616_v59 = vadd.f32 %v2881_v54, %v605_v55  ;;  %v617_v60 = vadd.f32 %v2881_v54, %v606_v56  ;;  %v618_v61 = vadd.f32 %v2881_v54, %v607_v57  ;;  %v619_v62 = vadd.f32 %v2881_v54, %v608_v58 }
 0x1ee   :  { %vm620_vm9 = vcmp.ge.f32.partialorder %v616_v59, 0.0  ;;  %vm621_vm13 = vcmp.ge.f32.partialorder %v617_v60, 0.0  ;;  %vm622_vm4 = vcmp.ge.f32.partialorder %v618_v61, 0.0  ;;  %vm623_vm6 = vcmp.ge.f32.partialorder %v619_v62, 0.0 }
 0x1ef   :  { %v624_v63 = vmul.f32 0.2, %v616_v59  ;;  %v625_v1 = vmul.f32 0.2, %v617_v60  ;;  %v626_v2 = vmul.f32 0.2, %v618_v61 }
 0x1f0   :  { %v627_v3 = vmul.f32 0.2, %v619_v62 }
 0x1f1   :  { %v628_v0 = vsel %vm620_vm9, %v616_v59, %v624_v63  ;;  %v629_v4 = vsel %vm621_vm13, %v617_v60, %v625_v1  ;;  %v630_v5 = vsel %vm622_vm4, %v618_v61, %v626_v2  ;;  %vm3743_vm9 = vmand %vm704_vm7, %vm79_vm3  ;;  %vm709_vm13 = vcmask 519168  }
 0x1f2   :  { %v631_v6 = vsel %vm623_vm6, %v619_v62, %v627_v3  ;;  %v3089_v7 = vpack.c.bf16 %v628_v0, %v628_v0  ;;  %v3090_v8 = vpack.c.bf16 %v629_v4, %v629_v4  ;;  %v3091_v9 = vpack.c.bf16 %v630_v5, %v630_v5 }
 0x1f3   :  { %v3092_v10 = vpack.c.bf16 %v631_v6, %v631_v6  ;;  %vm1425_vm4 = vcmask 1042433  }
 0x1f4   :  { %v661_v11 = vshrl.u32 %v3089_v7, 16  ;;  %v664_v12 = vshll.u32 %v3089_v7, 16  ;;  %v670_v13 = vshrl.u32 %v3090_v8, 16  ;;  %v673_v14 = vshll.u32 %v3090_v8, 16  ;;  %vm1426_vm7 = vmand %vm1425_vm4, %vm79_vm3 }
 0x1f5   :  { %v680_v15 = vshrl.u32 %v3091_v9, 16  ;;  %v683_v16 = vshll.u32 %v3091_v9, 16  ;;  %v689_v17 = vshrl.u32 %v3092_v10, 16  ;;  %v692_v18 = vshll.u32 %v3092_v10, 16  ;;  %v3230_v10 = vld [vmem:[#allocation8 + $0x70] sm:$0xff]  }
 0x1f6   :  { %v663_v19 = vrot.slane %v661_v11, 6  ;;  %v666_v20 = vrot.slane %v664_v12, 7  ;;  %v672_v21 = vrot.slane %v670_v13, 6  ;;  %v675_v22 = vrot.slane %v673_v14, 7  ;;  %3113 = vmatprep.subr.bf16.mxu0 %v3230_v10 }
 0x1f7   :  { %v682_v23 = vrot.slane %v680_v15, 6  ;;  %v685_v24 = vrot.slane %v683_v16, 7  ;;  %v691_v25 = vrot.slane %v689_v17, 6  ;;  %v694_v26 = vrot.slane %v692_v18, 7 }
 0x1f8   :  { %v667_v29 = vor.u32 %v666_v20, %v663_v19  ;;  %v676_v30 = vor.u32 %v675_v22, %v672_v21  ;;  %v3231_v20 = vld [vmem:[#allocation8 + $0x30] sm:$0xff]  }
 0x1f9   :  { %v686_v32 = vor.u32 %v685_v24, %v682_v23  ;;  %v695_v33 = vor.u32 %v694_v26, %v691_v25  ;;  %3114 = vmatpush3.bf16.msra.mxu0 %v3231_v20 }
 0x1fa   :  { %v668_v36 = vrot.slane %v667_v29, 4  ;;  %v678_v37 = vrot.slane %v676_v30, 4  ;;  %v707_v38 = vsel %vm3743_vm9, %v667_v29, %v706_v28 }
 0x1fb   :  { %v687_v40 = vrot.slane %v686_v32, 4  ;;  %v697_v41 = vrot.slane %v695_v33, 4  ;;  %708 = vst [vmem:[#allocation4] sm:$0xe] %v707_v38  ;;  %v715_v42 = vsel %vm3743_vm9, %v686_v32, %v714_v31  ;;  %v3235_v32 = vld [vmem:[#allocation8 + $0x78] sm:$0xff]  }
 0x1fc   :  { %v677_v43 = vsel %vm3665_vm10, %v668_v36, %v676_v30  ;;  %v712_v44 = vsel %vm3712_vm5, %v678_v37, %v711_v34  ;;  %716 = vst [vmem:[#allocation4 + $0xc] sm:$0xe] %v715_v42  ;;  %3115 = vmatprep.subr.bf16.mxu0 %v3235_v32 }
 0x1fd   :  { %v696_v45 = vsel %vm3665_vm10, %v687_v40, %v695_v33  ;;  %710 = vst.msk [vmem:[#allocation4 + $0x4] sm:$0xf] %vm709_vm13, %v677_v43  ;;  %713 = vst [vmem:[#allocation4 + $0x8] sm:$0x3] %v712_v44  ;;  %v719_v46 = vsel %vm3712_vm5, %v697_v41, %v718_v39  ;;  %v3236_v39 = vld [vmem:[#allocation8 + $0x38] sm:$0xff]   ;;  %vm791_vm5 = vcmask 1048064  }
 0x1fe   :  { %717 = vst.msk [vmem:[#allocation4 + $0x10] sm:$0xf] %vm709_vm13, %v696_v45  ;;  %720 = vst [vmem:[#allocation4 + $0x14] sm:$0x3] %v719_v46  ;;  %3116 = vmatpush3.bf16.msra.mxu0 %v3236_v39 }
 0x204   :  { %v3203_v49 = vld [vmem:[#allocation4] sm:$0xfe]   ;;  %v3204_v51 = vld [vmem:[#allocation4 + $0x8] ss:$0 sps:$4 sm:$0x33]  }
 0x205   :  { %v3205_v52 = vld [vmem:[#allocation4] sm:$0xff]   ;;  %v849_v53 = vshrl.u32 %v3203_v49, 16  ;;  %v852_v54 = vshll.u32 %v3203_v49, 16  ;;  %v857_v55 = vshrl.u32 %v3204_v51, 16  ;;  %v860_v56 = vshll.u32 %v3204_v51, 16  ;;  %v3209_v62 = vld [vmem:[#allocation4 + $0xc] sm:$0xff]  }
 0x206   :  { %v3206_v57 = vld [vmem:[#allocation4 + $0x8] ss:$0 sps:$4 sm:$0x11]   ;;  %v762_v58 = vshrl.u32 %v3205_v52, 16  ;;  %v764_v61 = vshll.u32 %v3205_v52, 16  ;;  %v3229_v3 = vld [vmem:[#allocation4] sm:$0xff]  }
 0x207   :  { %v851_v59 = vrot.slane %v849_v53, 1  ;;  %v854_v60 = vrot.slane %v852_v54, 2  ;;  %v859_v63 = vrot.slane %v857_v55, 1  ;;  %v862_v1 = vrot.slane %v860_v56, 2  ;;  %v3207_v47 = vld [vmem:[#allocation4 + $0xc] sm:$0xfe]  }
 0x208   :  { %v769_v2 = vshll.u32 %v3206_v57, 16  ;;  %v766_v4 = vrot.slane %v764_v61, 1  ;;  %v3208_v5 = vld [vmem:[#allocation4 + $0x14] ss:$0 sps:$4 sm:$0x33]   ;;  %v866_v8 = vshrl.u32 %v3207_v47, 16 }
 0x209   :  { %v855_v0 = vor.u32 %v854_v60, %v851_v59  ;;  %v863_v6 = vor.u32 %v862_v1, %v859_v63  ;;  %v869_v9 = vshll.u32 %v3207_v47, 16  ;;  %737 = vst.msk [vmem:[#allocation5] sm:$0xff] %vm560_vm8, %v3229_v3  ;;  %v874_v12 = vshrl.u32 %v3208_v5, 16  ;;  %v3210_v14 = vld [vmem:[#allocation4 + $0x14] ss:$0 sps:$4 sm:$0x11]  }
 0x20a   :  { %v771_v7 = vrot.slane %v769_v2, 1  ;;  %v767_v11 = vor.u32 %v766_v4, %v762_v58  ;;  %v877_v13 = vshll.u32 %v3208_v5, 16  ;;  %v774_v15 = vshrl.u32 %v3209_v62, 16  ;;  %v3234_v25 = vld [vmem:[#allocation4 + $0xc] sm:$0xff]   ;;  %v3211_v28 = vld [vmem:[#allocation4] sm:$0xfc]  }
 0x20b   :  { %v864_v16 = vsel %vm297_vm15, %v855_v0, %v863_v6  ;;  %v868_v17 = vrot.slane %v866_v8, 1  ;;  %v871_v18 = vrot.slane %v869_v9, 2  ;;  %v776_v19 = vshll.u32 %v3209_v62, 16  ;;  %v3212_v29 = vld [vmem:[#allocation4 + $0x8] ss:$0 sps:$4 sm:$0x77]  }
 0x20c   :  { %882 = vrot.lane.b32.xlu0 %v864_v16, %s3532_s23  ;;  %v772_v21 = vsel %vm203_vm14, %v767_v11, %v771_v7  ;;  %v876_v22 = vrot.slane %v874_v12, 1  ;;  %v879_v23 = vrot.slane %v877_v13, 2  ;;  %v781_v24 = vshll.u32 %v3210_v14, 16  ;;  %738 = vst.msk [vmem:[#allocation5 + $0x20] sm:$0xff] %vm560_vm8, %v3234_v25  ;;  %v3213_v38 = vld [vmem:[#allocation4 + $0xc] sm:$0xfc]  }
 0x20d   :  { %785 = vrot.lane.b32.xlu1 %v772_v21, %s3532_s23  ;;  %v872_v26 = vor.u32 %v871_v18, %v868_v17  ;;  %v778_v27 = vrot.slane %v776_v19, 1  ;;  %v945_v34 = vshrl.u32 %v3211_v28, 16  ;;  %v948_v36 = vshll.u32 %v3211_v28, 16  ;;  %v3214_v42 = vld [vmem:[#allocation4 + $0x14] ss:$0 sps:$4 sm:$0x77]  }
 0x20e   :  { %v880_v30 = vor.u32 %v879_v23, %v876_v22  ;;  %v783_v31 = vrot.slane %v781_v24, 1  ;;  %v953_v37 = vshrl.u32 %v3212_v29, 16  ;;  %v956_v41 = vshll.u32 %v3212_v29, 16  ;;  %v3227_v56 = vld [vmem:[#allocation4 + $0x8] ss:$0 sps:$4 sm:$0x11]  }
 0x20f   :  { %v779_v33 = vor.u32 %v778_v27, %v774_v15  ;;  %v947_v44 = vrot.slane %v945_v34, 2  ;;  %v950_v45 = vrot.slane %v948_v36, 3  ;;  %v962_v51 = vshrl.u32 %v3213_v38, 16  ;;  %v3228_v57 = vld [vmem:[#allocation4] sm:$0xfe]   ;;  %v3241_v36 = vld [vmem:[#allocation8 + $0x80] sm:$0xff]  }
 0x210   :  { %v881_v40 = vsel %vm297_vm15, %v872_v26, %v880_v30  ;;  %v955_v46 = vrot.slane %v953_v37, 2  ;;  %v958_v49 = vrot.slane %v956_v41, 3  ;;  %v965_v52 = vshll.u32 %v3213_v38, 16  ;;  %v3232_v5 = vld [vmem:[#allocation4 + $0xc] sm:$0xfe]  }
 0x211   :  { %884 = vrot.lane.b32.xlu0 %v881_v40, %s3532_s23  ;;  %v784_v43 = vsel %vm203_vm14, %v779_v33, %v783_v31  ;;  %v970_v53 = vshrl.u32 %v3214_v42, 16  ;;  %v951_v54 = vor.u32 %v950_v45, %v947_v44  ;;  %v973_v55 = vshll.u32 %v3214_v42, 16  ;;  %v3233_v6 = vld [vmem:[#allocation4 + $0x14] ss:$0 sps:$4 sm:$0x11]   ;;  %v3242_v40 = vld [vmem:[#allocation8 + $0x88] sm:$0xff]  }
 0x212   :  { %787 = vrot.lane.b32.xlu1 %v784_v43, %s3532_s23  ;;  %v959_v58 = vor.u32 %v958_v49, %v955_v46  ;;  %v964_v59 = vrot.slane %v962_v51, 2  ;;  %v967_v60 = vrot.slane %v965_v52, 3  ;;  %v817_v63 = vrot.slane %v3227_v56, 1  ;;  %v3237_v10 = vld [vmem:[#allocation4] sm:$0xfc]   ;;  %v3246_v46 = vld [vmem:[#allocation8 + $0x98] sm:$0xff]  }
 0x213   :  { %v972_v61 = vrot.slane %v970_v53, 2  ;;  %v975_v62 = vrot.slane %v973_v55, 3  ;;  %v816_v1 = vrot.slane %v3228_v57, 1  ;;  %v3541_v3 = vmov 0   ;;  %v3239_v15 = vld [vmem:[#allocation4 + $0xc] sm:$0xfc]  }
 0x214   :  { %v960_v2 = vsel %vm401_vm0, %v951_v54, %v959_v58  ;;  %v968_v47 = vor.u32 %v967_v60, %v964_v59  ;;  %1305 = vmatprep.subr.bf16.mxu0 %v3541_v3  ;;  %v819_v8 = vrot.slane %v3232_v5, 1  ;;  %v820_v9 = vrot.slane %v3233_v6, 1  ;;  %v3238_v11 = vld [vmem:[#allocation4 + $0x8] ss:$0 sps:$4 sm:$0x33]   ;;  %v3243_v43 = vld [vmem:[#allocation8 + $0x90] sm:$0xff]  }
 0x215   :  { %978 = vrot.lane.b32.xlu0 %v960_v2, %s3532_s23  ;;  %v976_v0 = vor.u32 %v975_v62, %v972_v61  ;;  %v818_v4 = vsel %vm259_vm12, %v816_v1, %v817_v63  ;;  %v912_v13 = vrot.slane %v3237_v10, 2  ;;  %v913_v14 = vrot.slane %v3238_v11, 2  ;;  %v3240_v16 = vld [vmem:[#allocation4 + $0x14] ss:$0 sps:$4 sm:$0x33]   ;;  %v3248_v51 = vld [vmem:[#allocation8 + $0xa8] sm:$0xff]  }
 0x216   :  { %824 = vst.msk [vmem:[#allocation5 + $0x8] sm:$0xff] %vm560_vm8, %v818_v4  ;;  %v821_v12 = vsel %vm259_vm12, %v819_v8, %v820_v9  ;;  %v915_v18 = vrot.slane %v3239_v15, 2  ;;  %v3244_v19 = vld [vmem:[#allocation4] sm:$0xf8]   ;;  %v916_v20 = vrot.slane %v3240_v16, 2  ;;  %v3247_v49 = vld [vmem:[#allocation8 + $0xa0] sm:$0xff]  }
 0x217   :  { %v977_v7 = vsel %vm401_vm0, %v968_v47, %v976_v0  ;;  %825 = vst.msk [vmem:[#allocation5 + $0x28] sm:$0xff] %vm560_vm8, %v821_v12  ;;  %v914_v17 = vsel %vm363_vm11, %v912_v13, %v913_v14  ;;  %v3245_v21 = vld [vmem:[#allocation4 + $0x8] ss:$0 sps:$4 sm:$0x77]   ;;  %v1008_v22 = vrot.slane %v3244_v19, 3  ;;  %v3249_v52 = vld [vmem:[#allocation8 + $0xb0] sm:$0xff]  }
 0x218   :  { %980 = vrot.lane.b32.xlu1 %v977_v7, %s3532_s23  ;;  %920 = vst.msk [vmem:[#allocation5 + $0x10] sm:$0xff] %vm560_vm8, %v914_v17  ;;  %v917_v23 = vsel %vm363_vm11, %v915_v18, %v916_v20  ;;  %v1009_v24 = vrot.slane %v3245_v21, 3  ;;  %v3255_v25 = vld [vmem:[#allocation4 + $0xc] sm:$0xf8]   ;;  %v3252_v55 = vld [vmem:[#allocation8 + $0xc8] sm:$0xff]   ;;  %v3253_v56 = vld [vmem:[#allocation8 + $0xd0] sm:$0xff]  }
 0x219   :  { %921 = vst.msk [vmem:[#allocation5 + $0x30] sm:$0xff] %vm560_vm8, %v917_v23  ;;  %v3256_v26 = vld [vmem:[#allocation4 + $0x14] ss:$0 sps:$4 sm:$0x77]   ;;  %v1011_v28 = vrot.slane %v3255_v25, 3  ;;  %v3250_v53 = vld [vmem:[#allocation8 + $0xb8] sm:$0xff]  }
 0x21a   :  { %v1010_v27 = vsel %vm467_vm2, %v1008_v22, %v1009_v24  ;;  %v1012_v29 = vrot.slane %v3256_v26, 3  ;;  %v3251_v54 = vld [vmem:[#allocation8 + $0xc0] sm:$0xff]   ;;  %v3254_v57 = vld [vmem:[#allocation8 + $0xd8] sm:$0xff]   ;;  %v1419_v8 = vld [vmem:[#allocation6] sm:$0x3] }
 0x21b   :  { %1016 = vst.msk [vmem:[#allocation5 + $0x18] sm:$0xff] %vm560_vm8, %v1010_v27  ;;  %v3257_v61 = vld [vmem:[#allocation11 + $0x104] ss:$8 sps:$4 sm:$0xff]   ;;  %v3262_v63 = vld [vmem:[#allocation11 + $0x100] ss:$8 sps:$4 sm:$0xff]  }
 0x21c   :  { %v1013_v30 = vsel %vm467_vm2, %v1011_v28, %v1012_v29  ;;  %v3261_v62 = vld [vmem:[#allocation11 + $0x4] ss:$8 sps:$4 sm:$0xff]   ;;  %2528 = vmatprep.subr.bf16.mxu1 %v3257_v61  ;;  %v3259_v1 = vld [vmem:[#allocation11] ss:$8 sps:$4 sm:$0xff]   ;;  %v3263_v2 = vld [vmem:[#allocation11 + $0x114] ss:$8 sps:$4 sm:$0xff]  }
 0x21d   :  { %1017 = vst.msk [vmem:[#allocation5 + $0x38] sm:$0xff] %vm560_vm8, %v1013_v30  ;;  %2529 = vmatpush1.bf16.msra.mxu1 %v3262_v63  ;;  %v3267_v47 = vld [vmem:[#allocation11 + $0x14] ss:$8 sps:$4 sm:$0xff]   ;;  %v3268_v0 = vld [vmem:[#allocation11 + $0x110] ss:$8 sps:$4 sm:$0xff]  }
 0x21e   :  { %2530 = vmatprep.subr.bf16.mxu1 %v3263_v2  ;;  %v3265_v4 = vld [vmem:[#allocation11 + $0x10] ss:$8 sps:$4 sm:$0xff]   ;;  %v3269_v5 = vld [vmem:[#allocation11 + $0x124] ss:$8 sps:$4 sm:$0xff]   ;;  %v3274_v7 = vld [vmem:[#allocation11 + $0x120] ss:$8 sps:$4 sm:$0xff]  }
 0x21f   :  { %v3273_v6 = vld [vmem:[#allocation11 + $0x24] ss:$8 sps:$4 sm:$0xff]   ;;  %v1422_v9 = vld [vmem:[#allocation6 + $0xc] sm:$0x3]  ;;  %v1427_v11 = vld [vmem:[#allocation6 + $0x8] sm:$0x6] }
 0x220   :  { %v1430_v12 = vld [vmem:[#allocation6 + $0x14] sm:$0x6]  ;;  %v3271_v16 = vld [vmem:[#allocation11 + $0x20] ss:$8 sps:$4 sm:$0xff]   ;;  %v1428_v18 = vsel %vm1426_vm7, 0, %v1427_v11 }
 0x221   :  { %2531 = vmatpush1.bf16.msra.mxu1 %v3268_v0  ;;  %v1431_v19 = vsel %vm1426_vm7, 0, %v1430_v12  ;;  %v3275_v20 = vld [vmem:[#allocation11 + $0x134] ss:$8 sps:$4 sm:$0xff]   ;;  %1429 = vst [vmem:[#allocation6 + $0x8] sm:$0x6] %v1428_v18 }
 0x222   :  { %v1021_v45 = vld [vmem:[#allocation5 + $0x18] sm:$0xff]  ;;  %2532 = vmatprep.subr.bf16.mxu1 %v3269_v5  ;;  %1432 = vst [vmem:[#allocation6 + $0x14] sm:$0x6] %v1431_v19  ;;  %v3277_v23 = vld [vmem:[#allocation11 + $0x30] ss:$8 sps:$4 sm:$0xff]  }
 0x223   :  { %v3279_v24 = vld [vmem:[#allocation11 + $0x34] ss:$8 sps:$4 sm:$0xff]   ;;  %v3280_v26 = vld [vmem:[#allocation11 + $0x130] ss:$8 sps:$4 sm:$0xff]   ;;  %v3281_v28 = vld [vmem:[#allocation11 + $0x144] ss:$8 sps:$4 sm:$0xff]  }
 0x224   :  { %v1025_v59 = vld [vmem:[#allocation5 + $0x38] sm:$0xff]  ;;  %v3316_v61 = vld [vmem:[#allocation11 + $0x190] ss:$8 sps:$4 sm:$0xff]   ;;  %v3327_v0 = vld [vmem:[#allocation11 + $0xb4] ss:$8 sps:$4 sm:$0xff]  }
 0x225   :  { %2533 = vmatpush1.bf16.msra.mxu1 %v3274_v7  ;;  %v3285_v29 = vld [vmem:[#allocation11 + $0x44] ss:$8 sps:$4 sm:$0xff]   ;;  %v3286_v30 = vld [vmem:[#allocation11 + $0x140] ss:$8 sps:$4 sm:$0xff]   ;;  %v3328_v5 = vld [vmem:[#allocation11 + $0x1b0] ss:$8 sps:$4 sm:$0xff]  }
 0x226   :  { %2534 = vmatprep.subr.bf16.mxu1 %v3275_v20  ;;  %v3321_v63 = vld [vmem:[#allocation11 + $0xa4] ss:$8 sps:$4 sm:$0xff]   ;;  %v3322_v2 = vld [vmem:[#allocation11 + $0x1a0] ss:$8 sps:$4 sm:$0xff]   ;;  %v3335_v11 = vld [vmem:[#allocation11 + $0x1d4] ss:$8 sps:$4 sm:$0xff]  }
 0x227   :  { %v3333_v7 = vld [vmem:[#allocation11 + $0xc4] ss:$8 sps:$4 sm:$0xff]   ;;  %v3339_v12 = vld [vmem:[#allocation11 + $0xd4] ss:$8 sps:$4 sm:$0xff]   ;;  %v3346_v18 = vld [vmem:[#allocation11 + $0x1e0] ss:$8 sps:$4 sm:$0xff]  }
 0x228   :  { %v3347_v19 = vld [vmem:[#allocation11 + $0x1f4] ss:$8 sps:$4 sm:$0xff]  }
 0x229   :  { %2535 = vmatpush1.bf16.msra.mxu1 %v3280_v26  ;;  %v3351_v20 = vld [vmem:[#allocation11 + $0xf4] ss:$8 sps:$4 sm:$0xff]   ;;  %v3349_v26 = vld [vmem:[#allocation11 + $0xf0] ss:$8 sps:$4 sm:$0xff]  }
 0x22a   :  { %2536 = vmatprep.subr.bf16.mxu1 %v3281_v28  ;;  %v3352_v28 = vld [vmem:[#allocation11 + $0x1f0] ss:$8 sps:$4 sm:$0xff]  }
 0x22d   :  { %2537 = vmatpush1.bf16.msra.mxu1 %v3286_v30 }
 0x27e   :  { %v883_v31 = vpop.permute.xlu0 %882 }
 0x27f   :  { %888 = vst.msk [vmem:[#allocation5 + $0x8] sm:$0xff] %vm791_vm5, %v883_v31  ;;  %v786_v32 = vpop.permute.xlu1 %785  ;;  %v3283_v31 = vld [vmem:[#allocation11 + $0x40] ss:$8 sps:$4 sm:$0xff]  }
 0x280   :  { %792 = vst.msk [vmem:[#allocation5] sm:$0xff] %vm791_vm5, %v786_v32 }
 0x283   :  { %v885_v33 = vpop.permute.xlu0 %884 }
 0x284   :  { %889 = vst.msk [vmem:[#allocation5 + $0x28] sm:$0xff] %vm791_vm5, %v885_v33  ;;  %v788_v34 = vpop.permute.xlu1 %787  ;;  %v3287_v33 = vld [vmem:[#allocation11 + $0x154] ss:$8 sps:$4 sm:$0xff]  }
 0x285   :  { %793 = vst.msk [vmem:[#allocation5 + $0x20] sm:$0xff] %vm791_vm5, %v788_v34  ;;  %2538 = vmatprep.subr.bf16.mxu1 %v3287_v33 }
 0x286   :  { %v1019_v37 = vld [vmem:[#allocation5 + $0x8] sm:$0xff] }
 0x287   :  { %1288 = vmatprep.mubr.bf16.mxu0 %v1019_v37  ;;  %v1018_v38 = vld [vmem:[#allocation5] sm:$0xff]  ;;  %v979_v39 = vpop.permute.xlu0 %978 }
 0x288   :  { %1289 = vmatmul.mubr.bf16.vlgmr.msra.gmra.mrb[4].mxu0 %v1018_v38  ;;  %984 = vst.msk [vmem:[#allocation5 + $0x10] sm:$0xff] %vm791_vm5, %v979_v39  ;;  %v3289_v39 = vld [vmem:[#allocation11 + $0x50] ss:$8 sps:$4 sm:$0xff]  }
 0x289   :  { %1306 = vmatpush1.bf16.msra.mxu0 %v3241_v36 }
 0x28a   :  { %1307 = vmatprep.subr.bf16.mxu0 %v3541_v3  ;;  %v981_v42 = vpop.permute.xlu1 %980 }
 0x28b   :  { %v1023_v41 = vld [vmem:[#allocation5 + $0x28] sm:$0xff]  ;;  %985 = vst.msk [vmem:[#allocation5 + $0x30] sm:$0xff] %vm791_vm5, %v981_v42 }
 0x28c   :  { %1296 = vmatprep.mubr.bf16.mxu0 %v1023_v41  ;;  %v1022_v44 = vld [vmem:[#allocation5 + $0x20] sm:$0xff]  ;;  %v3292_v42 = vld [vmem:[#allocation11 + $0x150] ss:$8 sps:$4 sm:$0xff]  }
 0x28d   :  { %1308 = vmatpush1.bf16.msra.mxu0 %v3242_v40  ;;  %v3291_v40 = vld [vmem:[#allocation11 + $0x54] ss:$8 sps:$4 sm:$0xff]   ;;  %2539 = vmatpush1.bf16.msra.mxu1 %v3292_v42 }
 0x28e   :  { %1309 = vmatprep.subr.bf16.mxu0 %v3541_v3 }
 0x28f   :  { %v1020_v58 = vld [vmem:[#allocation5 + $0x10] sm:$0xff] }
 0x290   :  { %1297 = vmatmul.mubr.bf16.gmra.mrb[8].mxu0 %v1022_v44  ;;  %v3297_v44 = vld [vmem:[#allocation11 + $0x64] ss:$8 sps:$4 sm:$0xff]  }
 0x291   :  { %1310 = vmatpush1.bf16.msra.mxu0 %v3243_v43  ;;  %2940 = vmatprep.mubr.msk.bf16.mxu0 %vm560_vm8, %v1021_v45  ;;  %v3293_v43 = vld [vmem:[#allocation11 + $0x164] ss:$8 sps:$4 sm:$0xff]   ;;  %v3295_v45 = vld [vmem:[#allocation11 + $0x60] ss:$8 sps:$4 sm:$0xff]  }
 0x292   :  { %1311 = vmatprep.subr.bf16.mxu0 %v3541_v3  ;;  %v1024_v60 = vld [vmem:[#allocation5 + $0x30] sm:$0xff]  ;;  %2540 = vmatprep.subr.bf16.mxu1 %v3293_v43 }
 0x295   :  { %1312 = vmatpush1.bf16.msra.mxu0 %v3246_v46  ;;  %v3298_v46 = vld [vmem:[#allocation11 + $0x160] ss:$8 sps:$4 sm:$0xff]  }
 0x296   :  { %1313 = vmatprep.subr.bf16.mxu0 %v3541_v3  ;;  %2541 = vmatpush1.bf16.msra.mxu1 %v3298_v46 }
 0x299   :  { %1314 = vmatpush1.bf16.msra.mxu0 %v3247_v49  ;;  %v3299_v49 = vld [vmem:[#allocation11 + $0x174] ss:$8 sps:$4 sm:$0xff]  }
 0x29a   :  { %1315 = vmatprep.subr.bf16.mxu0 %v3541_v3  ;;  %2542 = vmatprep.subr.bf16.mxu1 %v3299_v49 }
 0x29d   :  { %1316 = vmatpush1.bf16.msra.mxu0 %v3248_v51  ;;  %v3303_v51 = vld [vmem:[#allocation11 + $0x74] ss:$8 sps:$4 sm:$0xff]  }
 0x29e   :  { %1317 = vmatprep.subr.bf16.mxu0 %v3541_v3 }
 0x2a1   :  { %1318 = vmatpush1.bf16.msra.mxu0 %v3249_v52  ;;  %v3301_v52 = vld [vmem:[#allocation11 + $0x70] ss:$8 sps:$4 sm:$0xff]  }
 0x2a2   :  { %1319 = vmatprep.subr.bf16.mxu0 %v3541_v3 }
 0x2a5   :  { %1320 = vmatpush1.bf16.msra.mxu0 %v3250_v53  ;;  %v3304_v53 = vld [vmem:[#allocation11 + $0x170] ss:$8 sps:$4 sm:$0xff]  }
 0x2a6   :  { %1321 = vmatprep.subr.bf16.mxu0 %v3541_v3  ;;  %2543 = vmatpush1.bf16.msra.mxu1 %v3304_v53 }
 0x2a9   :  { %1322 = vmatpush1.bf16.msra.mxu0 %v3251_v54  ;;  %v3305_v54 = vld [vmem:[#allocation11 + $0x184] ss:$8 sps:$4 sm:$0xff]  }
 0x2aa   :  { %1323 = vmatprep.subr.bf16.mxu0 %v3541_v3  ;;  %2544 = vmatprep.subr.bf16.mxu1 %v3305_v54 }
 0x2ad   :  { %1324 = vmatpush1.bf16.msra.mxu0 %v3252_v55  ;;  %v3309_v55 = vld [vmem:[#allocation11 + $0x84] ss:$8 sps:$4 sm:$0xff]  }
 0x2ae   :  { %1325 = vmatprep.subr.bf16.mxu0 %v3541_v3 }
 0x2b1   :  { %1326 = vmatpush1.bf16.msra.mxu0 %v3253_v56  ;;  %v3307_v56 = vld [vmem:[#allocation11 + $0x80] ss:$8 sps:$4 sm:$0xff]  }
 0x2b2   :  { %1327 = vmatprep.subr.bf16.mxu0 %v3541_v3 }
 0x2b5   :  { %1328 = vmatpush1.bf16.msra.mxu0 %v3254_v57  ;;  %v3310_v57 = vld [vmem:[#allocation11 + $0x180] ss:$8 sps:$4 sm:$0xff]  }
 0x2b6   :  { %2475 = vmatprep.subr.bf16.mxu0 %v3261_v62  ;;  %2545 = vmatpush1.bf16.msra.mxu1 %v3310_v57  ;;  %v3317_v62 = vld [vmem:[#allocation11 + $0x1a4] ss:$8 sps:$4 sm:$0xff]  }
 0x2b8   :  { %1338 = vmatmul.mubr.bf16.vlgmr.msra.gmra.mrb[12].mxu0 %v1020_v58  ;;  %v3311_v58 = vld [vmem:[#allocation11 + $0x194] ss:$8 sps:$4 sm:$0xff]  }
 0x2b9   :  { %2941 = vmatprep.mubr.msk.bf16.mxu0 %vm560_vm8, %v1025_v59  ;;  %2476 = vmatpush1.bf16.msra.mxu0 %v3259_v1  ;;  %vm1417_vm8 = vcmask 1041408   ;;  %v3315_v59 = vld [vmem:[#allocation11 + $0x94] ss:$8 sps:$4 sm:$0xff]   ;;  %v3319_v1 = vld [vmem:[#allocation11 + $0xa0] ss:$8 sps:$4 sm:$0xff]  }
 0x2ba   :  { %2477 = vmatprep.subr.bf16.mxu0 %v3267_v47  ;;  %vm3806_vm6 = vmand %vm1417_vm8, %vm70_vm1  ;;  %2546 = vmatprep.subr.bf16.mxu1 %v3311_v58  ;;  %v3323_v47 = vld [vmem:[#allocation11 + $0x1b4] ss:$8 sps:$4 sm:$0xff]   ;;  %vm1489_vm8 = vcmask 1043457  }
 0x2bb   :  { %v1420_v14 = vsel %vm3806_vm6, 0, %v1419_v8  ;;  %v1423_v15 = vsel %vm3806_vm6, 0, %v1422_v9  ;;  %2547 = vmatpush1.bf16.msra.mxu1 %v3316_v61  ;;  %v3331_v8 = vld [vmem:[#allocation11 + $0xc0] ss:$8 sps:$4 sm:$0xff]   ;;  %vm3836_vm4 = vmand %vm1489_vm8, %vm79_vm3 }
 0x2bc   :  { %1421 = vst [vmem:[#allocation6] sm:$0x3] %v1420_v14  ;;  %1424 = vst [vmem:[#allocation6 + $0xc] sm:$0x3] %v1423_v15  ;;  %2548 = vmatprep.subr.bf16.mxu1 %v3317_v62  ;;  %v3334_v9 = vld [vmem:[#allocation11 + $0x1c0] ss:$8 sps:$4 sm:$0xff]  }
 0x2bd   :  { %2478 = vmatpush1.bf16.msra.mxu0 %v3265_v4  ;;  %v3325_v4 = vld [vmem:[#allocation11 + $0xb0] ss:$8 sps:$4 sm:$0xff]   ;;  %v3341_v15 = vld [vmem:[#allocation11 + $0x1e4] ss:$8 sps:$4 sm:$0xff]  }
 0x2be   :  { %2479 = vmatprep.subr.bf16.mxu0 %v3273_v6  ;;  %v3329_v6 = vld [vmem:[#allocation11 + $0x1c4] ss:$8 sps:$4 sm:$0xff]   ;;  %v3340_v14 = vld [vmem:[#allocation11 + $0x1d0] ss:$8 sps:$4 sm:$0xff]  }
 0x2bf   :  { %2549 = vmatpush1.bf16.msra.mxu1 %v3322_v2 }
 0x2c0   :  { %1346 = vmatmul.mubr.bf16.gmra.mrb[16].mxu0 %v1024_v60  ;;  %v3313_v60 = vld [vmem:[#allocation11 + $0x90] ss:$8 sps:$4 sm:$0xff]   ;;  %2550 = vmatprep.subr.bf16.mxu1 %v3323_v47 }
 0x2c1   :  { %2480 = vmatpush1.bf16.msra.mxu0 %v3271_v16  ;;  %v3345_v16 = vld [vmem:[#allocation11 + $0xe4] ss:$8 sps:$4 sm:$0xff]  }
 0x2c2   :  { %2481 = vmatprep.subr.bf16.mxu0 %v3279_v24 }
 0x2c3   :  { %2551 = vmatpush1.bf16.msra.mxu1 %v3328_v5  ;;  %v1384_v5 = vld [vmem:[%s3899_s5] sm:$0x1] }
 0x2c4   :  { %2552 = vmatprep.subr.bf16.mxu1 %v3329_v6 }
 0x2c5   :  { %2482 = vmatpush1.bf16.msra.mxu0 %v3277_v23 }
 0x2c6   :  { %2483 = vmatprep.subr.bf16.mxu0 %v3285_v29 }
 0x2c7   :  { %2553 = vmatpush1.bf16.msra.mxu1 %v3334_v9  ;;  %v2942_v9 = vld [vmem:[%s3900_s6] ss:$0 sm:$0xff] }
 0x2c8   :  { %2554 = vmatprep.subr.bf16.mxu1 %v3335_v11 }
 0x2c9   :  { %2484 = vmatpush1.bf16.msra.mxu0 %v3283_v31  ;;  %v3359_v31 = vld [vmem:[#allocation11 + $0x204] ss:$8 sps:$4 sm:$0xff]  }
 0x2ca   :  { %2485 = vmatprep.subr.bf16.mxu0 %v3291_v40 }
 0x2cb   :  { %2555 = vmatpush1.bf16.msra.mxu1 %v3340_v14 }
 0x2cc   :  { %2556 = vmatprep.subr.bf16.mxu1 %v3341_v15 }
 0x2cd   :  { %2486 = vmatpush1.bf16.msra.mxu0 %v3289_v39 }
 0x2ce   :  { %2487 = vmatprep.subr.bf16.mxu0 %v3297_v44 }
 0x2cf   :  { %2557 = vmatpush1.bf16.msra.mxu1 %v3346_v18 }
 0x2d0   :  { %2558 = vmatprep.subr.bf16.mxu1 %v3347_v19 }
 0x2d1   :  { %2488 = vmatpush1.bf16.msra.mxu0 %v3295_v45 }
 0x2d2   :  { %2489 = vmatprep.subr.bf16.mxu0 %v3303_v51 }
 0x2d3   :  { %2559 = vmatpush1.bf16.msra.mxu1 %v3352_v28 }
 0x2d4   :  { %2581 = vmatprep.subr.bf16.mxu1 %v3359_v31 }
 0x2d5   :  { %2490 = vmatpush1.bf16.msra.mxu0 %v3301_v52 }
 0x2d6   :  { %2491 = vmatprep.subr.bf16.mxu0 %v3309_v55 }
 0x2d9   :  { %2492 = vmatpush1.bf16.msra.mxu0 %v3307_v56 }
 0x2da   :  { %2493 = vmatprep.subr.bf16.mxu0 %v3315_v59 }
 0x2dd   :  { %2494 = vmatpush1.bf16.msra.mxu0 %v3313_v60 }
 0x2de   :  { %2495 = vmatprep.subr.bf16.mxu0 %v3321_v63 }
 0x2e1   :  { %2496 = vmatpush1.bf16.msra.mxu0 %v3319_v1 }
 0x2e2   :  { %2497 = vmatprep.subr.bf16.mxu0 %v3327_v0 }
 0x2e5   :  { %2498 = vmatpush1.bf16.msra.mxu0 %v3325_v4 }
 0x2e6   :  { %2499 = vmatprep.subr.bf16.mxu0 %v3333_v7 }
 0x2e9   :  { %2500 = vmatpush1.bf16.msra.mxu0 %v3331_v8 }
 0x2ea   :  { %2501 = vmatprep.subr.bf16.mxu0 %v3339_v12 }
 0x35b   :  { %v3117_v13 = vpop.f32.mrb[4].mxu0 }
 0x35c   :  { %v3118_v17 = vpop.f32.mrb[5].mxu0 }
 0x35d   :  { %v3815_v21 = vadd.f32 %v3118_v17, %v3117_v13  ;;  %v3120_v22 = vpop.f32.mrb[6].mxu0  ;;  %v3337_v13 = vld [vmem:[#allocation11 + $0xd0] ss:$8 sps:$4 sm:$0xff]   ;;  %v3343_v17 = vld [vmem:[#allocation11 + $0xe0] ss:$8 sps:$4 sm:$0xff]  }
 0x35e   :  { %v3121_v25 = vpop.f32.mrb[7].mxu0  ;;  %2502 = vmatpush1.bf16.msra.mxu0 %v3337_v13 }
 0x35f   :  { %v3817_v27 = vadd.f32 %v3121_v25, %v3120_v22  ;;  %2503 = vmatprep.subr.bf16.mxu0 %v3345_v16 }
 0x362   :  { %2504 = vmatpush1.bf16.msra.mxu0 %v3343_v17 }
 0x363   :  { %v3123_v32 = vpop.f32.mrb[8].mxu0  ;;  %2505 = vmatprep.subr.bf16.mxu0 %v3351_v20 }
 0x364   :  { %v3124_v34 = vpop.f32.mrb[9].mxu0 }
 0x365   :  { %v3819_v36 = vadd.f32 %v3124_v34, %v3123_v32  ;;  %v3126_v37 = vpop.f32.mrb[10].mxu0 }
 0x366   :  { %v3127_v38 = vpop.f32.mrb[11].mxu0  ;;  %2506 = vmatpush1.bf16.msra.mxu0 %v3349_v26 }
 0x367   :  { %v3821_v41 = vadd.f32 %v3127_v38, %v3126_v37 }
 0x38b   :  { %v1339_v22 = vpop.f32.mrb[12].mxu0 }
 0x38c   :  { %v1340_v23 = vadd.f32 %v3815_v21, %v1339_v22  ;;  %v1341_v24 = vpop.f32.mrb[13].mxu0 }
 0x38d   :  { %v1342_v25 = vpop.f32.mrb[14].mxu0 }
 0x38e   :  { %v1343_v29 = vadd.f32 %v3817_v27, %v1342_v25  ;;  %v1344_v30 = vpop.f32.mrb[15].mxu0 }
 0x390   :  { %v1354_v32 = vadd.f32 %v1343_v29, %v1340_v23 }
 0x393   :  { %v1347_v33 = vpop.f32.mrb[16].mxu0 }
 0x394   :  { %v1348_v34 = vadd.f32 %v3819_v36, %v1347_v33  ;;  %v1349_v21 = vpop.f32.mrb[17].mxu0 }
 0x395   :  { %v1350_v37 = vpop.f32.mrb[18].mxu0 }
 0x396   :  { %v1355_v38 = vadd.f32 %v1354_v32, %v1348_v34  ;;  %v1351_v39 = vadd.f32 %v3821_v41, %v1350_v37  ;;  %v1352_v40 = vpop.f32.mrb[19].mxu0 }
 0x398   :  { %v1356_v42 = vadd.f32 %v1355_v38, %v1351_v39 }
 0x39a   :  { %v1357_v43 = vrot.slane %v1356_v42, 4 }
 0x39c   :  { %v1358_v27 = vadd.f32 %v1357_v43, %v1356_v42 }
 0x39e   :  { %v1359_v44 = vrot.slane %v1358_v27, 2 }
 0x3a0   :  { %v1360_v45 = vadd.f32 %v1359_v44, %v1358_v27 }
 0x3a2   :  { %v1361_v46 = vrot.slane %v1360_v45, 1 }
 0x3a4   :  { %v1362_v49 = vadd.f32 %v1361_v46, %v1360_v45 }
 0x3a6   :  { %v1363_v51 = vmul.f32 0.03125, %v1362_v49 }
 0x3a8   :  { %v1364_v52 = vsub.f32 %v1340_v23, %v1363_v51  ;;  %v1365_v53 = vsub.f32 %v1343_v29, %v1363_v51  ;;  %v1366_v54 = vsub.f32 %v1348_v34, %v1363_v51  ;;  %v1367_v55 = vsub.f32 %v1351_v39, %v1363_v51 }
 0x3aa   :  { %v1368_v56 = vmul.f32 %v1364_v52, %v1364_v52  ;;  %v1369_v36 = vmul.f32 %v1365_v53, %v1365_v53  ;;  %v1370_v57 = vmul.f32 %v1366_v54, %v1366_v54  ;;  %v1371_v59 = vmul.f32 %v1367_v55, %v1367_v55 }
 0x3ac   :  { %v1372_v58 = vadd.f32 %v1369_v36, %v1368_v56  ;;  %v1498_v36 = vld [vmem:[#allocation6 + $0xc] sm:$0xe] }
 0x3ae   :  { %v1373_v60 = vadd.f32 %v1372_v58, %v1370_v57 }
 0x3b0   :  { %v1374_v41 = vadd.f32 %v1373_v60, %v1371_v59  ;;  %v1495_v59 = vld [vmem:[#allocation6 + $0x8] sm:$0x3] }
 0x3b2   :  { %v1375_v61 = vrot.slane %v1374_v41, 4 }
 0x3b4   :  { %v1376_v62 = vadd.f32 %v1375_v61, %v1374_v41 }
 0x3b6   :  { %v1377_v63 = vrot.slane %v1376_v62, 2 }
 0x3b8   :  { %v1378_v1 = vadd.f32 %v1377_v63, %v1376_v62  ;;  %v1502_v62 = vld [vmem:[#allocation6 + $0x14] sm:$0x3] }
 0x3ba   :  { %v1379_v2 = vrot.slane %v1378_v1, 1 }
 0x3bc   :  { %v1380_v47 = vadd.f32 %v1379_v2, %v1378_v1 }
 0x3be   :  { %v1381_v0 = vmul.f32 0.03125, %v1380_v47 }
 0x3c0   :  { %v1382_v4 = vadd.f32 1e-05, %v1381_v0 }
 0x3c2   :  { %3453 = vrsqrt.f32 %v1382_v4 }
 0x3cc   :  { %v3454_v6 = vpop.eup %3453 }
 0x3cd   :  { %v1385_v7 = vmul.f32 %v3454_v6, %v1384_v5 }
 0x3cf   :  { %v1389_v8 = vrot.slane %v1385_v7, %v3735_v50 }
 0x3d1   :  { %v1390_v11 = vmul.f32 %v1389_v8, %v1364_v52  ;;  %v1391_v12 = vmul.f32 %v1389_v8, %v1365_v53  ;;  %v1392_v13 = vmul.f32 %v1389_v8, %v1366_v54  ;;  %v1393_v14 = vmul.f32 %v1389_v8, %v1367_v55  ;;  %v1491_v54 = vld [vmem:[#allocation6] sm:$0xe] }
 0x3d3   :  { %v1401_v15 = vadd.f32 %v2942_v9, %v1390_v11  ;;  %v1402_v16 = vadd.f32 %v2942_v9, %v1391_v12  ;;  %v1403_v17 = vadd.f32 %v2942_v9, %v1392_v13  ;;  %v1404_v18 = vadd.f32 %v2942_v9, %v1393_v14 }
 0x3d5   :  { %vm1405_vm1 = vcmp.ge.f32.partialorder %v1401_v15, 0.0  ;;  %vm1406_vm9 = vcmp.ge.f32.partialorder %v1402_v16, 0.0  ;;  %vm1407_vm13 = vcmp.ge.f32.partialorder %v1403_v17, 0.0  ;;  %vm1408_vm5 = vcmp.ge.f32.partialorder %v1404_v18, 0.0 }
 0x3d6   :  { %v1409_v19 = vmul.f32 0.2, %v1401_v15  ;;  %v1410_v20 = vmul.f32 0.2, %v1402_v16  ;;  %v1411_v22 = vmul.f32 0.2, %v1403_v17 }
 0x3d7   :  { %v1412_v23 = vmul.f32 0.2, %v1404_v18 }
 0x3d8   :  { %v1413_v24 = vsel %vm1405_vm1, %v1401_v15, %v1409_v19  ;;  %v1414_v25 = vsel %vm1406_vm9, %v1402_v16, %v1410_v20  ;;  %v1415_v26 = vsel %vm1407_vm13, %v1403_v17, %v1411_v22 }
 0x3d9   :  { %v1416_v28 = vsel %vm1408_vm5, %v1404_v18, %v1412_v23  ;;  %v3093_v29 = vpack.c.bf16 %v1413_v24, %v1413_v24  ;;  %v3094_v30 = vpack.c.bf16 %v1414_v25, %v1414_v25  ;;  %v3095_v31 = vpack.c.bf16 %v1415_v26, %v1415_v26 }
 0x3da   :  { %v3096_v32 = vpack.c.bf16 %v1416_v28, %v1416_v28 }
 0x3db   :  { %v1446_v33 = vshrl.u32 %v3093_v29, 16  ;;  %v1449_v34 = vshll.u32 %v3093_v29, 16  ;;  %v1455_v21 = vshrl.u32 %v3094_v30, 16  ;;  %v1458_v37 = vshll.u32 %v3094_v30, 16 }
 0x3dc   :  { %v1465_v38 = vshrl.u32 %v3095_v31, 16  ;;  %v1468_v39 = vshll.u32 %v3095_v31, 16  ;;  %v1474_v40 = vshrl.u32 %v3096_v32, 16  ;;  %v1477_v42 = vshll.u32 %v3096_v32, 16  ;;  %v3357_v31 = vld [vmem:[#allocation11 + $0x200] ss:$8 sps:$4 sm:$0xff]  }
 0x3dd   :  { %v1448_v43 = vrot.slane %v1446_v33, 6  ;;  %v1451_v27 = vrot.slane %v1449_v34, 7  ;;  %v1457_v44 = vrot.slane %v1455_v21, 6  ;;  %v1460_v45 = vrot.slane %v1458_v37, 7 }
 0x3de   :  { %v1467_v46 = vrot.slane %v1465_v38, 6  ;;  %v1470_v49 = vrot.slane %v1468_v39, 7  ;;  %v1476_v51 = vrot.slane %v1474_v40, 6  ;;  %v1479_v52 = vrot.slane %v1477_v42, 7  ;;  %v3369_v38 = vld [vmem:[#allocation11 + $0x214] ss:$8 sps:$4 sm:$0xff]  }
 0x3df   :  { %v1452_v55 = vor.u32 %v1451_v27, %v1448_v43  ;;  %v1461_v56 = vor.u32 %v1460_v45, %v1457_v44 }
 0x3e0   :  { %v1471_v57 = vor.u32 %v1470_v49, %v1467_v46  ;;  %v1480_v58 = vor.u32 %v1479_v52, %v1476_v51  ;;  %v3367_v52 = vld [vmem:[#allocation11 + $0x210] ss:$8 sps:$4 sm:$0xff]  }
 0x3e1   :  { %v1453_v60 = vrot.slane %v1452_v55, 4  ;;  %v1463_v41 = vrot.slane %v1461_v56, 4  ;;  %v1492_v61 = vsel %vm3836_vm4, %v1452_v55, %v1491_v54 }
 0x3e2   :  { %v1472_v63 = vrot.slane %v1471_v57, 4  ;;  %v1482_v1 = vrot.slane %v1480_v58, 4  ;;  %1493 = vst [vmem:[#allocation6] sm:$0xe] %v1492_v61  ;;  %v1499_v2 = vsel %vm3836_vm4, %v1471_v57, %v1498_v36 }
 0x3e3   :  { %v1462_v47 = vsel %vm3665_vm10, %v1453_v60, %v1461_v56  ;;  %v1496_v0 = vsel %vm3806_vm6, %v1463_v41, %v1495_v59  ;;  %1500 = vst [vmem:[#allocation6 + $0xc] sm:$0xe] %v1499_v2  ;;  %v3372_v56 = vld [vmem:[#allocation11 + $0x224] ss:$8 sps:$4 sm:$0xff]  }
 0x3e4   :  { %v1481_v4 = vsel %vm3665_vm10, %v1472_v63, %v1480_v58  ;;  %1494 = vst [vmem:[#allocation6 + $0x4] sm:$0xf] %v1462_v47  ;;  %1497 = vst [vmem:[#allocation6 + $0x8] sm:$0x3] %v1496_v0  ;;  %v1503_v5 = vsel %vm3806_vm6, %v1482_v1, %v1502_v62  ;;  %v3370_v63 = vld [vmem:[#allocation11 + $0x220] ss:$8 sps:$4 sm:$0xff]  }
 0x3e5   :  { %1501 = vst [vmem:[#allocation6 + $0x10] sm:$0xf] %v1481_v4  ;;  %1504 = vst [vmem:[#allocation6 + $0x14] sm:$0x3] %v1503_v5 }
 0x3eb   :  { %v3353_v6 = vld [vmem:[#allocation6] sm:$0xff]   ;;  %v3354_v7 = vld [vmem:[#allocation6 + $0x8] ss:$0 sps:$4 sm:$0x11]  }
 0x3ec   :  { %v1548_v8 = vshll.u32 %v3353_v6, 16  ;;  %v3355_v9 = vld [vmem:[#allocation6] sm:$0xfe]   ;;  %v1553_v11 = vshll.u32 %v3354_v7, 16  ;;  %v1546_v13 = vshrl.u32 %v3353_v6, 16  ;;  %v3363_v19 = vld [vmem:[#allocation6 + $0xc] sm:$0xff]  }
 0x3ed   :  { %v3356_v12 = vld [vmem:[#allocation6 + $0x8] ss:$0 sps:$4 sm:$0x33]   ;;  %v1628_v15 = vshrl.u32 %v3355_v9, 16  ;;  %v1631_v16 = vshll.u32 %v3355_v9, 16  ;;  %v3360_v26 = vld [vmem:[#allocation6] sm:$0xff]  }
 0x3ee   :  { %v1550_v14 = vrot.slane %v1548_v8, 1  ;;  %v1555_v17 = vrot.slane %v1553_v11, 1  ;;  %v1636_v35 = vshrl.u32 %v3356_v12, 16  ;;  %v1639_v18 = vshll.u32 %v3356_v12, 16  ;;  %v3361_v23 = vld [vmem:[#allocation6] sm:$0xfe]  }
 0x3ef   :  { %v1630_v22 = vrot.slane %v1628_v15, 1  ;;  %v1633_v10 = vrot.slane %v1631_v16, 2  ;;  %v3362_v28 = vld [vmem:[#allocation6 + $0x8] ss:$0 sps:$4 sm:$0x11]   ;;  %v1595_v32 = vrot.slane %v3361_v23, 1 }
 0x3f0   :  { %v1551_v20 = vor.u32 %v1550_v14, %v1546_v13  ;;  %v1638_v24 = vrot.slane %v1636_v35, 1  ;;  %v1641_v25 = vrot.slane %v1639_v18, 2  ;;  %v3364_v33 = vld [vmem:[#allocation6 + $0x14] ss:$0 sps:$4 sm:$0x11]   ;;  %v1596_v21 = vrot.slane %v3362_v28, 1 }
 0x3f1   :  { %v1634_v30 = vor.u32 %v1633_v10, %v1630_v22  ;;  %v1560_v37 = vshll.u32 %v3363_v19, 16  ;;  %v1565_v39 = vshll.u32 %v3364_v33, 16  ;;  %v3365_v40 = vld [vmem:[#allocation6 + $0xc] sm:$0xfe]   ;;  %v1558_v27 = vshrl.u32 %v3363_v19, 16 }
 0x3f2   :  { %v1556_v29 = vsel %vm203_vm14, %v1551_v20, %v1555_v17  ;;  %v1642_v34 = vor.u32 %v1641_v25, %v1638_v24  ;;  %v3366_v42 = vld [vmem:[#allocation6 + $0x14] ss:$0 sps:$4 sm:$0x33]   ;;  %v1597_v45 = vsel %vm259_vm12, %v1595_v32, %v1596_v21  ;;  %v1645_v46 = vshrl.u32 %v3365_v40, 16  ;;  %v3374_v59 = vld [vmem:[#allocation6 + $0xc] sm:$0xfe]  }
 0x3f3   :  { %2507 = vmatprep.mubr.bf16.mxu0 %v1556_v29  ;;  %v1562_v44 = vrot.slane %v1560_v37, 1  ;;  %v1648_v49 = vshll.u32 %v3365_v40, 16  ;;  %v1653_v51 = vshrl.u32 %v3366_v42, 16  ;;  %v1567_v54 = vrot.slane %v1565_v39, 1  ;;  %v3373_v1 = vld [vmem:[#allocation6 + $0xc] sm:$0xff]  }
 0x3f4   :  { %2508 = vmatmul.mubr.bf16.vlgmr.msra.gmra.mrb[20].mxu0 %v3360_v26  ;;  %v1643_v43 = vsel %vm297_vm15, %v1634_v30, %v1642_v34  ;;  %v1656_v55 = vshll.u32 %v3366_v42, 16  ;;  %v1647_v36 = vrot.slane %v1645_v46, 1  ;;  %v3375_v61 = vld [vmem:[#allocation6 + $0x14] ss:$0 sps:$4 sm:$0x11]   ;;  %v1598_v2 = vrot.slane %v3374_v59, 1 }
 0x3f5   :  { %2560 = vmatprep.mubr.bf16.mxu1 %v1643_v43  ;;  %v1563_v53 = vor.u32 %v1562_v44, %v1558_v27  ;;  %v1650_v57 = vrot.slane %v1648_v49, 2  ;;  %v1655_v58 = vrot.slane %v1653_v51, 1  ;;  %v1599_v0 = vrot.slane %v3375_v61, 1  ;;  %v3376_v4 = vld [vmem:[#allocation6] sm:$0xfc]  }
 0x3f6   :  { %2561 = vmatmul.mubr.bf16.vlgmr.msra.gmra.mrb[0].mxu1 %v1597_v45  ;;  %v1658_v41 = vrot.slane %v1656_v55, 2  ;;  %v3377_v5 = vld [vmem:[#allocation6 + $0x8] ss:$0 sps:$4 sm:$0x77]   ;;  %v1720_v7 = vshrl.u32 %v3376_v4, 16  ;;  %v1723_v8 = vshll.u32 %v3376_v4, 16 }
 0x3f7   :  { %2582 = vmatpush1.bf16.msra.mxu1 %v3357_v31  ;;  %v1568_v60 = vsel %vm203_vm14, %v1563_v53, %v1567_v54  ;;  %v1651_v62 = vor.u32 %v1650_v57, %v1647_v36  ;;  %v3380_v9 = vld [vmem:[#allocation11 + $0x234] ss:$8 sps:$4 sm:$0xff]   ;;  %v1600_v11 = vsel %vm259_vm12, %v1598_v2, %v1599_v0  ;;  %v1728_v12 = vshrl.u32 %v3377_v5, 16  ;;  %v3378_v35 = vld [vmem:[#allocation11 + $0x230] ss:$8 sps:$4 sm:$0xff]  }
 0x3f8   :  { %2583 = vmatprep.subr.bf16.mxu1 %v3369_v38  ;;  %2517 = vmatprep.mubr.bf16.mxu0 %v1568_v60  ;;  %v1659_v47 = vor.u32 %v1658_v41, %v1655_v58  ;;  %v1731_v13 = vshll.u32 %v3377_v5, 16  ;;  %v1722_v14 = vrot.slane %v1720_v7, 2  ;;  %v1725_v15 = vrot.slane %v1723_v8, 3  ;;  %v3383_v19 = vld [vmem:[#allocation11 + $0x244] ss:$8 sps:$4 sm:$0xff]  }
 0x3f9   :  { %v1730_v16 = vrot.slane %v1728_v12, 2  ;;  %v3381_v10 = vld [vmem:[#allocation11 + $0x240] ss:$8 sps:$4 sm:$0xff]   ;;  %v3386_v23 = vld [vmem:[#allocation11 + $0x254] ss:$8 sps:$4 sm:$0xff]  }
 0x3fa   :  { %v1660_v6 = vsel %vm297_vm15, %v1651_v62, %v1659_v47  ;;  %v1733_v17 = vrot.slane %v1731_v13, 3  ;;  %v1726_v18 = vor.u32 %v1725_v15, %v1722_v14  ;;  %v3384_v24 = vld [vmem:[#allocation11 + $0x250] ss:$8 sps:$4 sm:$0xff]   ;;  %v3389_v25 = vld [vmem:[#allocation11 + $0x264] ss:$8 sps:$4 sm:$0xff]  }
 0x3fb   :  { %2584 = vmatpush1.bf16.msra.mxu1 %v3367_v52  ;;  %2570 = vmatprep.mubr.bf16.mxu1 %v1660_v6  ;;  %v3387_v26 = vld [vmem:[#allocation11 + $0x260] ss:$8 sps:$4 sm:$0xff]   ;;  %v3392_v28 = vld [vmem:[#allocation11 + $0x274] ss:$8 sps:$4 sm:$0xff]   ;;  %v3390_v29 = vld [vmem:[#allocation11 + $0x270] ss:$8 sps:$4 sm:$0xff]  }
 0x3fc   :  { %2518 = vmatmul.mubr.bf16.gmra.mrb[24].mxu0 %v3373_v1  ;;  %2585 = vmatprep.subr.bf16.mxu1 %v3372_v56  ;;  %v1734_v20 = vor.u32 %v1733_v17, %v1730_v16  ;;  %v3395_v30 = vld [vmem:[#allocation11 + $0x284] ss:$8 sps:$4 sm:$0xff]   ;;  %v3393_v31 = vld [vmem:[#allocation11 + $0x280] ss:$8 sps:$4 sm:$0xff]   ;;  %v3398_v32 = vld [vmem:[#allocation11 + $0x294] ss:$8 sps:$4 sm:$0xff]  }
 0x3fd   :  { %v3396_v33 = vld [vmem:[#allocation11 + $0x290] ss:$8 sps:$4 sm:$0xff]   ;;  %v3401_v34 = vld [vmem:[#allocation11 + $0x2a4] ss:$8 sps:$4 sm:$0xff]   ;;  %v3399_v21 = vld [vmem:[#allocation11 + $0x2a0] ss:$8 sps:$4 sm:$0xff]  }
 0x3fe   :  { %2571 = vmatmul.mubr.bf16.gmra.mrb[4].mxu1 %v1600_v11  ;;  %v1735_v22 = vsel %vm401_vm0, %v1726_v18, %v1734_v20  ;;  %v3404_v37 = vld [vmem:[#allocation11 + $0x2b4] ss:$8 sps:$4 sm:$0xff]   ;;  %v3402_v38 = vld [vmem:[#allocation11 + $0x2b0] ss:$8 sps:$4 sm:$0xff]   ;;  %v3407_v39 = vld [vmem:[#allocation11 + $0x2c4] ss:$8 sps:$4 sm:$0xff]  }
 0x3ff   :  { %2586 = vmatpush1.bf16.msra.mxu1 %v3370_v63  ;;  %2613 = vmatprep.mubr.bf16.mxu1 %v1735_v22  ;;  %v3405_v40 = vld [vmem:[#allocation11 + $0x2c0] ss:$8 sps:$4 sm:$0xff]   ;;  %v3410_v42 = vld [vmem:[#allocation11 + $0x2d4] ss:$8 sps:$4 sm:$0xff]   ;;  %v3408_v44 = vld [vmem:[#allocation11 + $0x2d0] ss:$8 sps:$4 sm:$0xff]  }
 0x400   :  { %2587 = vmatprep.subr.bf16.mxu1 %v3380_v9  ;;  %v3422_v43 = vld [vmem:[#allocation6 + $0xc] sm:$0xfc]   ;;  %v3423_v27 = vld [vmem:[#allocation6 + $0x14] ss:$0 sps:$4 sm:$0x77]  }
 0x401   :  { %v3413_v45 = vld [vmem:[#allocation11 + $0x2e4] ss:$8 sps:$4 sm:$0xff]   ;;  %v1737_v46 = vshrl.u32 %v3422_v43, 16  ;;  %v1740_v49 = vshll.u32 %v3422_v43, 16  ;;  %v1745_v51 = vshrl.u32 %v3423_v27, 16  ;;  %v1748_v52 = vshll.u32 %v3423_v27, 16 }
 0x402   :  { %v3411_v53 = vld [vmem:[#allocation11 + $0x2e0] ss:$8 sps:$4 sm:$0xff]   ;;  %v3416_v54 = vld [vmem:[#allocation11 + $0x2f4] ss:$8 sps:$4 sm:$0xff]   ;;  %v3414_v60 = vld [vmem:[#allocation11 + $0x2f0] ss:$8 sps:$4 sm:$0xff]  }
 0x403   :  { %2588 = vmatpush1.bf16.msra.mxu1 %v3378_v35  ;;  %v3417_v55 = vld [vmem:[#allocation6] sm:$0xfc]   ;;  %v3418_v56 = vld [vmem:[#allocation6 + $0x8] ss:$0 sps:$4 sm:$0x33]   ;;  %v1739_v36 = vrot.slane %v1737_v46, 2 }
 0x404   :  { %2589 = vmatprep.subr.bf16.mxu1 %v3383_v19  ;;  %v1742_v57 = vrot.slane %v1740_v49, 3  ;;  %v1747_v58 = vrot.slane %v1745_v51, 2  ;;  %v1750_v59 = vrot.slane %v1748_v52, 3  ;;  %v3421_v41 = vld [vmem:[#allocation11 + $0x304] ss:$8 sps:$4 sm:$0xff]   ;;  %v1687_v61 = vrot.slane %v3417_v55, 2 }
 0x405   :  { %v1688_v62 = vrot.slane %v3418_v56, 2  ;;  %v3419_v2 = vld [vmem:[#allocation11 + $0x300] ss:$8 sps:$4 sm:$0xff]   ;;  %v3426_v47 = vld [vmem:[#allocation11 + $0x314] ss:$8 sps:$4 sm:$0xff]  }
 0x406   :  { %v1743_v63 = vor.u32 %v1742_v57, %v1739_v36  ;;  %v1751_v1 = vor.u32 %v1750_v59, %v1747_v58  ;;  %v3427_v4 = vld [vmem:[#allocation6 + $0xc] sm:$0xfc]   ;;  %v3428_v5 = vld [vmem:[#allocation6 + $0x14] ss:$0 sps:$4 sm:$0x33]  }
 0x407   :  { %2590 = vmatpush1.bf16.msra.mxu1 %v3381_v10  ;;  %v1689_v0 = vsel %vm363_vm11, %v1687_v61, %v1688_v62  ;;  %v3424_v7 = vld [vmem:[#allocation11 + $0x310] ss:$8 sps:$4 sm:$0xff]   ;;  %v3431_v8 = vld [vmem:[#allocation11 + $0x324] ss:$8 sps:$4 sm:$0xff]   ;;  %v1690_v9 = vrot.slane %v3427_v4, 2  ;;  %v1691_v11 = vrot.slane %v3428_v5, 2 }
 0x408   :  { %2591 = vmatprep.subr.bf16.mxu1 %v3386_v23  ;;  %v1752_v6 = vsel %vm401_vm0, %v1743_v63, %v1751_v1  ;;  %v3429_v12 = vld [vmem:[#allocation11 + $0x320] ss:$8 sps:$4 sm:$0xff]   ;;  %v3434_v13 = vld [vmem:[#allocation11 + $0x334] ss:$8 sps:$4 sm:$0xff]   ;;  %v3432_v15 = vld [vmem:[#allocation11 + $0x330] ss:$8 sps:$4 sm:$0xff]  }
 0x409   :  { %v1692_v14 = vsel %vm363_vm11, %v1690_v9, %v1691_v11  ;;  %v3437_v16 = vld [vmem:[#allocation11 + $0x344] ss:$8 sps:$4 sm:$0xff]   ;;  %v3435_v17 = vld [vmem:[#allocation11 + $0x340] ss:$8 sps:$4 sm:$0xff]   ;;  %v3440_v35 = vld [vmem:[#allocation11 + $0x354] ss:$8 sps:$4 sm:$0xff]  }
 0x40a   :  { %v3438_v18 = vld [vmem:[#allocation11 + $0x350] ss:$8 sps:$4 sm:$0xff]   ;;  %v3443_v19 = vld [vmem:[#allocation11 + $0x364] ss:$8 sps:$4 sm:$0xff]   ;;  %v3441_v20 = vld [vmem:[#allocation11 + $0x360] ss:$8 sps:$4 sm:$0xff]  }
 0x40b   :  { %2592 = vmatpush1.bf16.msra.mxu1 %v3384_v24  ;;  %v3446_v22 = vld [vmem:[#allocation11 + $0x374] ss:$8 sps:$4 sm:$0xff]   ;;  %v3447_v10 = vld [vmem:[#allocation6] sm:$0xf8]   ;;  %v3444_v24 = vld [vmem:[#allocation11 + $0x370] ss:$8 sps:$4 sm:$0xff]  }
 0x40c   :  { %2593 = vmatprep.subr.bf16.mxu1 %v3389_v25  ;;  %v3448_v23 = vld [vmem:[#allocation6 + $0x8] ss:$0 sps:$4 sm:$0x77]   ;;  %v1779_v25 = vrot.slane %v3447_v10, 3 }
 0x40f   :  { %2594 = vmatpush1.bf16.msra.mxu1 %v3387_v26  ;;  %v1780_v26 = vrot.slane %v3448_v23, 3 }
 0x410   :  { %2595 = vmatprep.subr.bf16.mxu1 %v3392_v28 }
 0x411   :  { %v1781_v28 = vsel %vm467_vm2, %v1779_v25, %v1780_v26 }
 0x413   :  { %2596 = vmatpush1.bf16.msra.mxu1 %v3390_v29  ;;  %v3449_v29 = vld [vmem:[#allocation6 + $0xc] sm:$0xf8]  }
 0x414   :  { %2597 = vmatprep.subr.bf16.mxu1 %v3395_v30  ;;  %v3450_v30 = vld [vmem:[#allocation6 + $0x14] ss:$0 sps:$4 sm:$0x77]  }
 0x417   :  { %2598 = vmatpush1.bf16.msra.mxu1 %v3393_v31  ;;  %v1782_v31 = vrot.slane %v3449_v29, 3 }
 0x418   :  { %2599 = vmatprep.subr.bf16.mxu1 %v3398_v32  ;;  %v1783_v32 = vrot.slane %v3450_v30, 3 }
 0x41b   :  { %2600 = vmatpush1.bf16.msra.mxu1 %v3396_v33  ;;  %v1784_v33 = vsel %vm467_vm2, %v1782_v31, %v1783_v32 }
 0x41c   :  { %2601 = vmatprep.subr.bf16.mxu1 %v3401_v34 }
 0x41f   :  { %2602 = vmatpush1.bf16.msra.mxu1 %v3399_v21 }
 0x420   :  { %2603 = vmatprep.subr.bf16.mxu1 %v3404_v37 }
 0x423   :  { %2604 = vmatpush1.bf16.msra.mxu1 %v3402_v38 }
 0x424   :  { %2605 = vmatprep.subr.bf16.mxu1 %v3407_v39 }
 0x427   :  { %2606 = vmatpush1.bf16.msra.mxu1 %v3405_v40 }
 0x428   :  { %2607 = vmatprep.subr.bf16.mxu1 %v3410_v42 }
 0x42b   :  { %2608 = vmatpush1.bf16.msra.mxu1 %v3408_v44 }
 0x42c   :  { %2609 = vmatprep.subr.bf16.mxu1 %v3413_v45 }
 0x42f   :  { %2610 = vmatpush1.bf16.msra.mxu1 %v3411_v53 }
 0x430   :  { %2611 = vmatprep.subr.bf16.mxu1 %v3416_v54 }
 0x433   :  { %2612 = vmatpush1.bf16.msra.mxu1 %v3414_v60 }
 0x434   :  { %2634 = vmatprep.subr.bf16.mxu1 %v3421_v41 }
 0x436   :  { %2614 = vmatmul.mubr.bf16.vlgmr.msra.gmra.mrb[0].mxu1 %v1689_v0 }
 0x437   :  { %2623 = vmatprep.mubr.bf16.mxu1 %v1752_v6  ;;  %2635 = vmatpush1.bf16.msra.mxu1 %v3419_v2 }
 0x438   :  { %2636 = vmatprep.subr.bf16.mxu1 %v3426_v47 }
 0x43b   :  { %2637 = vmatpush1.bf16.msra.mxu1 %v3424_v7 }
 0x43c   :  { %2638 = vmatprep.subr.bf16.mxu1 %v3431_v8 }
 0x43e   :  { %2624 = vmatmul.mubr.bf16.gmra.mrb[4].mxu1 %v1692_v14 }
 0x43f   :  { %2639 = vmatpush1.bf16.msra.mxu1 %v3429_v12  ;;  %2666 = vmatprep.mubr.bf16.mxu1 %v3541_v3 }
 0x440   :  { %2640 = vmatprep.subr.bf16.mxu1 %v3434_v13 }
 0x443   :  { %2641 = vmatpush1.bf16.msra.mxu1 %v3432_v15 }
 0x444   :  { %2642 = vmatprep.subr.bf16.mxu1 %v3437_v16 }
 0x447   :  { %2643 = vmatpush1.bf16.msra.mxu1 %v3435_v17 }
 0x448   :  { %2644 = vmatprep.subr.bf16.mxu1 %v3440_v35 }
 0x44b   :  { %2645 = vmatpush1.bf16.msra.mxu1 %v3438_v18 }
 0x44c   :  { %2646 = vmatprep.subr.bf16.mxu1 %v3443_v19 }
 0x44f   :  { %2647 = vmatpush1.bf16.msra.mxu1 %v3441_v20 }
 0x450   :  { %2648 = vmatprep.subr.bf16.mxu1 %v3446_v22 }
 0x453   :  { %2649 = vmatpush1.bf16.msra.mxu1 %v3444_v24 }
 0x456   :  { %2667 = vmatmul.mubr.bf16.vlgmr.msra.gmra.mrb[0].mxu1 %v1781_v28 }
 0x457   :  { %2676 = vmatprep.mubr.bf16.mxu1 %v3541_v3 }
 0x45e   :  { %2677 = vmatmul.mubr.bf16.gmra.mrb[4].mxu1 %v1784_v33 }
 0x4c7   :  { %v2509_v34 = vpop.f32.mrb[20].mxu0 }
 0x4c8   :  { %v2511_v21 = vpop.f32.mrb[21].mxu0 }
 0x4c9   :  { %v2513_v37 = vpop.f32.mrb[22].mxu0 }
 0x4ca   :  { %v2515_v38 = vpop.f32.mrb[23].mxu0 }
 0x4cf   :  { %v2519_v39 = vpop.f32.mrb[24].mxu0 }
 0x4d0   :  { %v2521_v40 = vpop.f32.mrb[25].mxu0 }
 0x4d1   :  { %v2523_v42 = vpop.f32.mrb[26].mxu0 }
 0x4d2   :  { %v2525_v43 = vpop.f32.mrb[27].mxu0 }
 0x529   :  { %v2668_v27 = vpop.f32.mrb[0].mxu1 }
 0x52a   :  { %v3137_v44 = vadd.f32 %v2668_v27, %v2509_v34  ;;  %v2670_v45 = vpop.f32.mrb[1].mxu1 }
 0x52b   :  { %v3138_v46 = vadd.f32 %v2670_v45, %v2511_v21  ;;  %v2672_v49 = vpop.f32.mrb[2].mxu1 }
 0x52c   :  { %v3139_v51 = vadd.f32 %v2672_v49, %v2513_v37  ;;  %v2674_v3 = vpop.f32.mrb[3].mxu1 }
 0x52d   :  { %v3140_v52 = vadd.f32 %v2674_v3, %v2515_v38 }
 0x52e   :  { %v2687_v53 = vadd.f32 %v3139_v51, %v3137_v44 }
 0x52f   :  { %v2696_v54 = vadd.f32 %v3140_v52, %v3138_v46 }
 0x531   :  { %v2678_v55 = vpop.f32.mrb[4].mxu1 }
 0x532   :  { %v3141_v56 = vadd.f32 %v2678_v55, %v2519_v39  ;;  %v2680_v36 = vpop.f32.mrb[5].mxu1 }
 0x533   :  { %v3142_v57 = vadd.f32 %v2680_v36, %v2521_v40  ;;  %v2682_v58 = vpop.f32.mrb[6].mxu1  ;;  %v2747_v36 = vld [vmem:[%s3902_s8] sm:$0x3]  ;;  %s3542_s8 = smov [#allocation13]  }
 0x534   :  { %v2688_v59 = vadd.f32 %v3141_v56, %v2687_v53  ;;  %v3143_v60 = vadd.f32 %v2682_v58, %v2523_v42  ;;  %v2684_v41 = vpop.f32.mrb[7].mxu1  ;;  %v2752_v58 = vrot.slane %v2747_v36, %v3735_v50 }
 0x535   :  { %v2697_v61 = vadd.f32 %v3142_v57, %v2696_v54  ;;  %v3144_v62 = vadd.f32 %v2684_v41, %v2525_v43  ;;  %v2777_v41 = vld [vmem:[%s3903_s9] sm:$0x3]  ;;  %s2834_s9 = sshll.u32 %s3542_s8, 4  ;;  %s2835_s9 = int_to_ptr.vmem [resolvable:$true] %s2834_s9 }
 0x536   :  { %v2689_v63 = vadd.f32 %v3143_v60, %v2688_v59  ;;  %s3503_s7 = scalar_lea.vmem %s2835_s9, 1024  ;;  %p3508_p3 = scmp.lt.s32.totalorder %s2835_s9, %s2835_s9 }
 0x537   :  { %v2698_v1 = vadd.f32 %v3144_v62, %v2697_v61  ;;  %p3504_p2 = scmp.ne.s32.totalorder %s2835_s9, %s3503_s7  ;;  %p3509_p4 = scmp.lt.s32.totalorder %s3503_s7, %s3503_s7 }
 0x538   :  { %v2690_v2 = vrot.slane %v2689_v63, 4 }
 0x539   :  { %v2699_v47 = vrot.slane %v2698_v1, 4  ;;  %p3510_p5 = por %p3509_p4, %p3508_p3 }
 0x53a   :  { %v2691_v0 = vadd.f32 %v2690_v2, %v2689_v63  ;;  %v2782_v2 = vrot.slane %v2777_v41, %v3735_v50 }
 0x53b   :  { %v2700_v4 = vadd.f32 %v2699_v47, %v2698_v1  ;;  %p3511_p6 = pnand %p3510_p5, %p3504_p2 }
 0x53c   :  { %v2692_v5 = vrot.slane %v2691_v0, 2 }
 0x53d   :  { %v2701_v6 = vrot.slane %v2700_v4, 2 }
 0x53e   :  { %v2693_v7 = vadd.f32 %v2692_v5, %v2691_v0 }
 0x53f   :  { %v2702_v8 = vadd.f32 %v2701_v6, %v2700_v4 }
 0x540   :  { %v2694_v9 = vrot.slane %v2693_v7, 1 }
 0x541   :  { %v2703_v11 = vrot.slane %v2702_v8, 1 }
 0x542   :  { %v2695_v12 = vadd.f32 %v2694_v9, %v2693_v7 }
 0x543   :  { %v2704_v13 = vadd.f32 %v2703_v11, %v2702_v8 }
 0x544   :  { %v2705_v14 = vmul.f32 0.03125, %v2695_v12 }
 0x545   :  { %v2706_v15 = vmul.f32 0.03125, %v2704_v13 }
 0x546   :  { %v2707_v16 = vsub.f32 %v3137_v44, %v2705_v14  ;;  %v2709_v17 = vsub.f32 %v3139_v51, %v2705_v14  ;;  %v2711_v35 = vsub.f32 %v3141_v56, %v2705_v14  ;;  %v2713_v18 = vsub.f32 %v3143_v60, %v2705_v14 }
 0x547   :  { %v2708_v19 = vsub.f32 %v3138_v46, %v2706_v15  ;;  %v2710_v20 = vsub.f32 %v3140_v52, %v2706_v15  ;;  %v2712_v22 = vsub.f32 %v3142_v57, %v2706_v15  ;;  %v2714_v10 = vsub.f32 %v3144_v62, %v2706_v15 }
 0x548   :  { %v2715_v23 = vmul.f32 %v2707_v16, %v2707_v16  ;;  %v2717_v24 = vmul.f32 %v2709_v17, %v2709_v17  ;;  %v2719_v28 = vmul.f32 %v2711_v35, %v2711_v35  ;;  %v2721_v32 = vmul.f32 %v2713_v18, %v2713_v18 }
 0x549   :  { %v2716_v25 = vmul.f32 %v2708_v19, %v2708_v19  ;;  %v2718_v26 = vmul.f32 %v2710_v20, %v2710_v20  ;;  %v2720_v30 = vmul.f32 %v2712_v22, %v2712_v22  ;;  %v2722_v34 = vmul.f32 %v2714_v10, %v2714_v10 }
 0x54a   :  { %v2723_v29 = vadd.f32 %v2717_v24, %v2715_v23  ;;  %v2755_v57 = vsub.s32 1, %v3729_v48 }
 0x54b   :  { %v2732_v31 = vadd.f32 %v2718_v26, %v2716_v25 }
 0x54c   :  { %v2724_v33 = vadd.f32 %v2723_v29, %v2719_v28  ;;  %v2756_v59 = vrot.slane %v2747_v36, %v2755_v57  ;;  %v2786_v0 = vrot.slane %v2777_v41, %v2755_v57 }
 0x54d   :  { %v2733_v21 = vadd.f32 %v2732_v31, %v2720_v30 }
 0x54e   :  { %v2725_v37 = vadd.f32 %v2724_v33, %v2721_v32 }
 0x54f   :  { %v2734_v38 = vadd.f32 %v2733_v21, %v2722_v34 }
 0x550   :  { %v2726_v39 = vrot.slane %v2725_v37, 4 }
 0x551   :  { %v2735_v40 = vrot.slane %v2734_v38, 4 }
 0x552   :  { %v2727_v42 = vadd.f32 %v2726_v39, %v2725_v37 }
 0x553   :  { %v2736_v43 = vadd.f32 %v2735_v40, %v2734_v38 }
 0x554   :  { %v2728_v27 = vrot.slane %v2727_v42, 2 }
 0x555   :  { %v2737_v44 = vrot.slane %v2736_v43, 2 }
 0x556   :  { %v2729_v45 = vadd.f32 %v2728_v27, %v2727_v42 }
 0x557   :  { %v2738_v46 = vadd.f32 %v2737_v44, %v2736_v43 }
 0x558   :  { %v2730_v49 = vrot.slane %v2729_v45, 1 }
 0x559   :  { %v2739_v51 = vrot.slane %v2738_v46, 1 }
 0x55a   :  { %v2731_v3 = vadd.f32 %v2730_v49, %v2729_v45 }
 0x55b   :  { %v2740_v52 = vadd.f32 %v2739_v51, %v2738_v46 }
 0x55c   :  { %v2741_v53 = vmul.f32 0.03125, %v2731_v3 }
 0x55d   :  { %v2742_v54 = vmul.f32 0.03125, %v2740_v52 }
 0x55e   :  { %v2743_v55 = vadd.f32 1e-05, %v2741_v53 }
 0x55f   :  { %v2744_v56 = vadd.f32 1e-05, %v2742_v54 }
 0x560   :  { %3455 = vrsqrt.f32 %v2743_v55 }
 0x561   :  { %3457 = vrsqrt.f32 %v2744_v56 }
 0x56a   :  { %v3456_v60 = vpop.eup %3455 }
 0x56b   :  { %v3458_v61 = vpop.eup %3457  ;;  %v2759_v62 = vmul.f32 %v3456_v60, %v2752_v58 }
 0x56c   :  { %v2760_v63 = vmul.f32 %v3458_v61, %v2756_v59 }
 0x56d   :  { %v2764_v1 = vrot.slane %v2759_v62, %v3735_v50 }
 0x56e   :  { %v2768_v47 = vrot.slane %v2760_v63, %v3735_v50 }
 0x56f   :  { %v2769_v4 = vmul.f32 %v2764_v1, %v2707_v16  ;;  %v2771_v48 = vmul.f32 %v2764_v1, %v2709_v17  ;;  %v2773_v5 = vmul.f32 %v2764_v1, %v2711_v35  ;;  %v2775_v6 = vmul.f32 %v2764_v1, %v2713_v18 }
 0x570   :  { %v2770_v7 = vmul.f32 %v2768_v47, %v2708_v19  ;;  %v2772_v8 = vmul.f32 %v2768_v47, %v2710_v20  ;;  %v2774_v9 = vmul.f32 %v2768_v47, %v2712_v22  ;;  %v2776_v11 = vmul.f32 %v2768_v47, %v2714_v10 }
 0x571   :  { %v2789_v12 = vadd.f32 %v2782_v2, %v2769_v4  ;;  %v2791_v13 = vadd.f32 %v2782_v2, %v2771_v48  ;;  %v2793_v14 = vadd.f32 %v2782_v2, %v2773_v5  ;;  %v2795_v15 = vadd.f32 %v2782_v2, %v2775_v6 }
 0x572   :  { %v2790_v23 = vadd.f32 %v2786_v0, %v2770_v7  ;;  %v2792_v24 = vadd.f32 %v2786_v0, %v2772_v8  ;;  %v2794_v25 = vadd.f32 %v2786_v0, %v2774_v9  ;;  %v2796_v26 = vadd.f32 %v2786_v0, %v2776_v11 }
 0x573   :  { %vm2797_vm3 = vcmp.ge.f32.partialorder %v2789_v12, 0.0  ;;  %vm2799_vm10 = vcmp.ge.f32.partialorder %v2791_v13, 0.0  ;;  %vm2801_vm11 = vcmp.ge.f32.partialorder %v2793_v14, 0.0  ;;  %vm2803_vm12 = vcmp.ge.f32.partialorder %v2795_v15, 0.0 }
 0x574   :  { %v2805_v50 = vmul.f32 0.2, %v2789_v12  ;;  %v2807_v16 = vmul.f32 0.2, %v2791_v13  ;;  %v2809_v17 = vmul.f32 0.2, %v2793_v14 }
 0x575   :  { %v2811_v35 = vmul.f32 0.2, %v2795_v15  ;;  %vm2798_vm14 = vcmp.ge.f32.partialorder %v2790_v23, 0.0  ;;  %vm2800_vm15 = vcmp.ge.f32.partialorder %v2792_v24, 0.0  ;;  %vm2802_vm0 = vcmp.ge.f32.partialorder %v2794_v25, 0.0 }
 0x576   :  { %v2813_v18 = vsel %vm2797_vm3, %v2789_v12, %v2805_v50  ;;  %v2815_v19 = vsel %vm2799_vm10, %v2791_v13, %v2807_v16  ;;  %v2817_v20 = vsel %vm2801_vm11, %v2793_v14, %v2809_v17  ;;  %vm2804_vm2 = vcmp.ge.f32.partialorder %v2796_v26, 0.0 }
 0x577   :  { %v2819_v22 = vsel %vm2803_vm12, %v2795_v15, %v2811_v35  ;;  %2821 = vst [vmem:[#allocation13] sm:$0xff] %v2813_v18  ;;  %2823 = vst [vmem:[#allocation13 + $0x10] sm:$0xff] %v2815_v19  ;;  %v2806_v10 = vmul.f32 0.2, %v2790_v23  ;;  %v2808_v28 = vmul.f32 0.2, %v2792_v24 }
 0x578   :  { %2825 = vst [vmem:[#allocation13 + $0x20] sm:$0xff] %v2817_v20  ;;  %v2810_v29 = vmul.f32 0.2, %v2794_v25  ;;  %2827 = vst [vmem:[#allocation13 + $0x30] sm:$0xff] %v2819_v22  ;;  %v2812_v30 = vmul.f32 0.2, %v2796_v26 }
 0x579   :  { %v2814_v31 = vsel %vm2798_vm14, %v2790_v23, %v2806_v10  ;;  %v2816_v32 = vsel %vm2800_vm15, %v2792_v24, %v2808_v28 }
 0x57a   :  { %v2818_v33 = vsel %vm2802_vm0, %v2794_v25, %v2810_v29  ;;  %v2820_v34 = vsel %vm2804_vm2, %v2796_v26, %v2812_v30  ;;  %2822 = vst [vmem:[#allocation13 + $0x8] sm:$0xff] %v2814_v31  ;;  %2824 = vst [vmem:[#allocation13 + $0x18] sm:$0xff] %v2816_v32 }
 0x57b   :  { %2826 = vst [vmem:[#allocation13 + $0x28] sm:$0xff] %v2818_v33  ;;  %2828 = vst [vmem:[#allocation13 + $0x38] sm:$0xff] %v2820_v34 }
 0x57c   :  { %3514 = shalt.err (!%p3511_p6)
}
 0x57d   :  { %s3515_s22 = scalar_lea.hbm %s3904_s10, 1024 }
 0x57e   :  { %p3516_p7 = scmp.ne.s32.totalorder %s3904_s10, %s3515_s22  ;;  %p3519_p8 = scmp.lt.u32.totalorder %s3515_s22, %s3904_s10 }
 0x580   :  { %p3521_p9 = pnand %p3519_p8, %p3516_p7 }
 0x582   :  { %3524 = shalt.err (!%p3521_p9)
}
 0x583   :  { %s3543_s29 = smov 256  }
 0x584   :  { %2840 = dma.vmem_to_hbm [thread:$0]  %s2835_s9, 1024, %s3904_s10, [#allocation10], %s3543_s29, %s3543_s29, %s3537_s0  }
 0x585   :  { %3529 = dma.done.wait [#allocation10], 1024  }
 0x586   :  { %3530 = vsyncadd [#allocation10], 4294966272 }
 0x587   :  { %2844 = vsyncpa [#allocation9], 1 }
 0x588   :  { %2845 = vsyncpa [#allocation12], 1 }
 0x589   :  { %2846 = vsyncpa [#allocation10], 1 }

</bundles_post_ra>
